<compile_context>
chip_gen: v7x
topology: tpu7x:2x2x1
jax: 0.10.0
libtpu: 0.0.40
codegen_flags: <defaults>
</compile_context>

<pallas_src>
import functools
import math

import jax
import jax.numpy as jnp
from jax.experimental import pallas as pl
from jax.experimental.pallas import tpu as pltpu

_BIG = 3.0e38    # Python floats -> literals inside kernels (no captured constants)
_NEG = -3.0e38
_KPAD = 128      # lane-padded width of the running k-smallest buffer
_E_PAD = 128     # lane-padded instance-embedding width (returned array only)
_C_PAD = 128     # lane-padded classifier width (returned array only)
_RESIDENT_BYTES_MAX = 12 * 1024 * 1024   # raw key-side bytes allowed to live in VMEM


def _pick_fusion_tiles():
    """tm=256 on 256-wide-MXU generations (v6e/v7x), tm=128 on v5e / unknown."""
    try:
        kind = jax.devices()[0].device_kind.lower()
    except Exception:  # pragma: no cover
        kind = ""
    if ("v6" in kind) or ("v7" in kind):
        return 256, 256
    return 128, 256


# ---------------------------------------------------------------------------
# Kernel 1: fused MLP front-end (Linear[+folded BN]+ReLU twice, add, plain Linear)
# ---------------------------------------------------------------------------
def _mlp_kernel(f_sem_ref, f_ins_ref,
                w1_ref, b1_ref, w2_ref, b2_ref, w3_ref, b3_ref,
                e_ref):
    h_sem = jnp.maximum(
        jnp.dot(f_sem_ref[...], w1_ref[...], preferred_element_type=jnp.float32)
        + b1_ref[...], 0.0)
    h_ins = jnp.maximum(
        jnp.dot(f_ins_ref[...], w2_ref[...], preferred_element_type=jnp.float32)
        + b2_ref[...], 0.0)
    # instance_embedding_fc: plain Linear (dropout identity at eval); output lane-padded.
    e_ref[...] = jnp.dot(h_ins + h_sem, w3_ref[...],
                         preferred_element_type=jnp.float32) + b3_ref[...]


# ---------------------------------------------------------------------------
# Kernel 2: streaming k-th-smallest squared distance per query row
#   grid = (query tiles [parallel], key tiles [arbitrary/reduction])
#   Key-side refs are tile-major 3-D: [key-tile, feat, tk]; `idx` selects the tile
#   (idx = j when the whole key set is VMEM-resident, 0 when it streams tile by tile).
# ---------------------------------------------------------------------------
def _kth_kernel(q_ref, kt_ref, qn_ref, kn_ref, bq_ref, bk_ref,
                kth_ref, r_ref, *, k, resident):
    j = pl.program_id(1)
    last = pl.num_programs(1) - 1
    idx = j if resident else 0

    @pl.when(j == 0)
    def _():
        r_ref[...] = jnp.full(r_ref.shape, _BIG, jnp.float32)

    kt = kt_ref[idx]          # (E, TK)
    kn = kn_ref[idx]          # (1, TK)
    bk = bk_ref[idx]          # (1, TK)

    # squared euclidean distances on the MXU: d2 = |q|^2 + |x|^2 - 2 q.x
    dot = jnp.dot(q_ref[...], kt, preferred_element_type=jnp.float32)
    d2 = jnp.maximum(qn_ref[...] + kn - 2.0 * dot, 0.0)
    same = bq_ref[...] == bk                               # (TM,1)==(1,TK) -> (TM,TK)
    d2m = jnp.where(same, d2, _BIG)                        # exclude other graphs / padding

    # merge the running k-smallest buffer with this key tile
    work = jnp.concatenate([r_ref[...], d2m], axis=1)      # (TM, KPAD + TK)
    n_rows, w = work.shape
    col_ids = jax.lax.broadcasted_iota(jnp.int32, (n_rows, w), 1)
    lane_ids = jax.lax.broadcasted_iota(jnp.int32, (n_rows, _KPAD), 1)

    r_new = jnp.full((n_rows, _KPAD), _BIG, jnp.float32)
    m = None
    for pos in range(k):  # k is small & static -> fully unrolled at trace time
        m = jnp.min(work, axis=1, keepdims=True)
        r_new = jnp.where(lane_ids == pos, m, r_new)
        if pos < k - 1:
            # remove exactly ONE occurrence of the minimum (exact torch.topk tie handling);
            # skipped after the final extraction (pure savings, identical result).
            first = jnp.min(jnp.where(work == m, col_ids, w), axis=1, keepdims=True)
            work = jnp.where(col_ids == first, _BIG, work)

    @pl.when(j != last)
    def _():
        r_ref[...] = r_new          # running buffer not needed after the last key tile

    @pl.when(j == last)
    def _():
        kth_ref[...] = m            # k-th smallest squared distance


# ---------------------------------------------------------------------------
# Kernel 3: thresholded kNN max-pool of semantic features + classifier
#   grid = (query tiles [parallel], key tiles [arbitrary/reduction])
#   f_sem is key-transposed (F, TK): keys stay on the lane axis -> 128-lane-dense
#   selects and a native lane reduction, no (TM, TK, F) spill.
# ---------------------------------------------------------------------------
def _pool_kernel(q_ref, kt_ref, qn_ref, kn_ref, kth_ref, fsemT_ref,
                 bq_ref, bk_ref, wc_ref, bc_ref,
                 p_ref, acc_ref, *, thr_sq, resident):
    j = pl.program_id(1)
    last = pl.num_programs(1) - 1
    idx = j if resident else 0

    @pl.when(j == 0)
    def _():
        acc_ref[...] = jnp.full(acc_ref.shape, _NEG, jnp.float32)

    kt = kt_ref[idx]              # (E, TK)
    kn = kn_ref[idx]              # (1, TK)
    bk = bk_ref[idx]              # (1, TK)
    fsemT = fsemT_ref[idx]        # (F, TK)

    dot = jnp.dot(q_ref[...], kt, preferred_element_type=jnp.float32)
    d2 = jnp.maximum(qn_ref[...] + kn - 2.0 * dot, 0.0)
    same = bq_ref[...] == bk
    d2m = jnp.where(same, d2, _BIG)

    # Within kNN radius AND within distance threshold (other graphs / padding already pushed
    # to _BIG). A point's own distance is ~0, so out-of-threshold neighbours fall back to the
    # point itself, exactly as `knn_thresh` / `instance_fusion` do.
    mask = (d2m <= kth_ref[...]) & (d2m <= thr_sq)          # (TM, TK)

    # masked max-pool, one semantic channel at a time: 2-D (TM, TK) select + lane reduce,
    # working set stays register-sized instead of materialising a (TM, TK, F) temp.
    n_f = fsemT.shape[0]
    cols = []
    for f in range(n_f):
        vals = jnp.where(mask, fsemT[f:f + 1, :], _NEG)     # (TM, TK)
        cols.append(jnp.max(vals, axis=1, keepdims=True))   # (TM, 1)
    cur = jnp.concatenate(cols, axis=1)                      # (TM, F)
    acc_ref[...] = jnp.maximum(acc_ref[...], cur)

    @pl.when(j == last)
    def _():
        # classifier_fc: plain Linear (dropout identity at eval); output lane-padded.
        p_ref[...] = jnp.dot(acc_ref[...], wc_ref[...],
                             preferred_element_type=jnp.float32) + bc_ref[...]


# ---------------------------------------------------------------------------
# Wrapper
# ---------------------------------------------------------------------------
def asis_forward(f_sem, f_ins, batch, params, *, k, distance_threshold,
                 norm_degree=2, tm=None, tk=None, tm_mlp=512, keys_resident=None):
    # TODO(synk): cosine-distance kNN path (norm_degree != 2) not implemented.
    assert norm_degree == 2, "only euclidean (norm_degree=2) instance fusion implemented"
    if tm is None or tk is None:
        d_tm, d_tk = _pick_fusion_tiles()
        tm = d_tm if tm is None else tm
        tk = d_tk if tk is None else tk
    assert 1 <= k <= _KPAD
    assert tm % 8 == 0 and tk % 128 == 0 and tm_mlp % 8 == 0

    N, F = f_sem.shape
    I = f_ins.shape[1]
    E = params["w3"].shape[1]
    C = params["wc"].shape[1]
    assert E <= _E_PAD and C <= _C_PAD

    # ---- fold eval-mode BatchNorm into the Linear weights (host side) ----
    w1f = params["w1"] * params["g1"]
    b1f = params["b1"] * params["g1"] + params["s1"]
    w2f = params["w2"] * params["g2"]
    b2f = params["b2"] * params["g2"] + params["s2"]

    # ---- lane-pad narrow projections so kernel stores are unmasked / lane-dense ----
    w3p = jnp.zeros((F, _E_PAD), jnp.float32).at[:, :E].set(params["w3"])
    b3p = jnp.zeros((1, _E_PAD), jnp.float32).at[:, :E].set(params["b3"])
    wcp = jnp.zeros((F, _C_PAD), jnp.float32).at[:, :C].set(params["wc"])
    bcp = jnp.zeros((1, _C_PAD), jnp.float32).at[:, :C].set(params["bc"])

    # ---- pad point count; sentinel batch id -1 so padded rows never match real points ----
    step = math.lcm(tm_mlp, math.lcm(tm, tk))
    n_pad = ((N + step - 1) // step) * step
    pad = n_pad - N
    f_sem_p = jnp.pad(f_sem.astype(jnp.float32), ((0, pad), (0, 0)))
    f_ins_p = jnp.pad(f_ins.astype(jnp.float32), ((0, pad), (0, 0)))
    batch_p = jnp.pad(batch.astype(jnp.int32), (0, pad), constant_values=-1)

    rowmap = lambda i: (i, 0)
    fixed1 = lambda i: (0, 0)

    # ------------------ kernel 1: fused MLP front-end ------------------
    # TODO(synk): bf16 MXU operands skipped on purpose; kept f32 for exactness vs reference.
    e_pad = pl.pallas_call(
        _mlp_kernel,
        out_shape=jax.ShapeDtypeStruct((n_pad, _E_PAD), jnp.float32),
        grid=(n_pad // tm_mlp,),
        in_specs=[
            pl.BlockSpec((tm_mlp, F), rowmap),
            pl.BlockSpec((tm_mlp, I), rowmap),
            pl.BlockSpec((F, F), fixed1), pl.BlockSpec((1, F), fixed1),
            pl.BlockSpec((I, F), fixed1), pl.BlockSpec((1, F), fixed1),
            pl.BlockSpec((F, _E_PAD), fixed1), pl.BlockSpec((1, _E_PAD), fixed1),
        ],
        out_specs=pl.BlockSpec((tm_mlp, _E_PAD), rowmap),
        compiler_params=pltpu.CompilerParams(
            dimension_semantics=("parallel",),
            vmem_limit_bytes=32 * 1024 * 1024),
    )(f_sem_p, f_ins_p, w1f, b1f, w2f, b2f, w3p, b3p)

    # ---- key-side prep at native widths (no lane padding on the O(N^2) streams) ----
    n_tiles = n_pad // tk
    e8 = e_pad[:, :E]                                        # (n_pad, E)
    sqn = jnp.sum(e8 * e8, axis=1)                           # (n_pad,)
    qn = sqn.reshape(n_pad, 1)
    bcol = batch_p.reshape(n_pad, 1)
    # tile-major 3-D key layouts: [key tile, feature, tk] -> dynamic first-axis indexing
    e_kt3 = e8.reshape(n_tiles, tk, E).transpose(0, 2, 1)        # (T, E, tk)
    sqn3 = sqn.reshape(n_tiles, 1, tk)                           # (T, 1, tk)
    bat3 = batch_p.reshape(n_tiles, 1, tk)                       # (T, 1, tk)
    fsem3 = f_sem_p.reshape(n_tiles, tk, F).transpose(0, 2, 1)   # (T, F, tk)

    # Resident keys: fetched once per pallas_call (constant index map) when they fit the
    # budget; otherwise streamed one tk-wide tile per reduction step.
    if keys_resident is None:
        keys_resident = n_pad * 4 * (E + F + 2) <= _RESIDENT_BYTES_MAX

    qmap = lambda i, j: (i, 0)
    fixed2 = lambda i, j: (0, 0)
    if keys_resident:
        kmap3 = lambda i, j: (0, 0, 0)
        kt_spec = pl.BlockSpec((n_tiles, E, tk), kmap3)
        kn_spec = pl.BlockSpec((n_tiles, 1, tk), kmap3)
        bk_spec = pl.BlockSpec((n_tiles, 1, tk), kmap3)
        fs_spec = pl.BlockSpec((n_tiles, F, tk), kmap3)
    else:
        kmap3 = lambda i, j: (j, 0, 0)
        kt_spec = pl.BlockSpec((1, E, tk), kmap3)
        kn_spec = pl.BlockSpec((1, 1, tk), kmap3)
        bk_spec = pl.BlockSpec((1, 1, tk), kmap3)
        fs_spec = pl.BlockSpec((1, F, tk), kmap3)

    grid2 = (n_pad // tm, n_tiles)
    fusion_cp = pltpu.CompilerParams(
        dimension_semantics=("parallel", "arbitrary"),
        vmem_limit_bytes=48 * 1024 * 1024)   # also fits v7x's 64 MiB VMEM

    # --------------- kernel 2: streaming k-th smallest distance ---------------
    kth = pl.pallas_call(
        functools.partial(_kth_kernel, k=k, resident=keys_resident),
        out_shape=jax.ShapeDtypeStruct((n_pad, 1), jnp.float32),
        grid=grid2,
        in_specs=[
            pl.BlockSpec((tm, E), qmap),     # query embeddings (native E)
            kt_spec,                         # key embeddings, tile-major (T, E, tk)
            pl.BlockSpec((tm, 1), qmap),     # |q|^2
            kn_spec,                         # |x|^2
            pl.BlockSpec((tm, 1), qmap),     # query batch ids
            bk_spec,                         # key batch ids
        ],
        out_specs=pl.BlockSpec((tm, 1), qmap),
        scratch_shapes=[pltpu.VMEM((tm, _KPAD), jnp.float32)],
        compiler_params=fusion_cp,
    )(e8, e_kt3, qn, sqn3, bcol, bat3)

    # --------- kernel 3: thresholded kNN max-pool + classifier ---------
    p_pad = pl.pallas_call(
        functools.partial(_pool_kernel, thr_sq=float(distance_threshold) ** 2,
                          resident=keys_resident),
        out_shape=jax.ShapeDtypeStruct((n_pad, _C_PAD), jnp.float32),
        grid=grid2,
        in_specs=[
            pl.BlockSpec((tm, E), qmap),     # query embeddings
            kt_spec,                         # key embeddings
            pl.BlockSpec((tm, 1), qmap),     # |q|^2
            kn_spec,                         # |x|^2
            pl.BlockSpec((tm, 1), qmap),     # k-th distances
            fs_spec,                         # key semantic features, key-transposed
            pl.BlockSpec((tm, 1), qmap),     # query batch ids
            bk_spec,                         # key batch ids
            pl.BlockSpec((F, _C_PAD), fixed2),
            pl.BlockSpec((1, _C_PAD), fixed2),
        ],
        out_specs=pl.BlockSpec((tm, _C_PAD), qmap),
        scratch_shapes=[pltpu.VMEM((tm, F), jnp.float32)],
        compiler_params=fusion_cp,
    )(e8, e_kt3, qn, sqn3, kth, fsem3, bcol, bat3, wcp, bcp)

    return p_pad[:N, :C], e_pad[:N, :E]


# ---------------------------------------------------------------------------
# Deterministic parameter construction + reference + test
# ---------------------------------------------------------------------------
def _make_params(key, feature_dim, inst_emb_dim, num_class, inst_in=8, eps=1e-5):
    ks = jax.random.split(key, 8)

    def lin(kw, kb, fin, fout):
        bound = 1.0 / (fin ** 0.5)
        w = jax.random.uniform(kw, (fin, fout), jnp.float32, -bound, bound)
        b = jax.random.uniform(kb, (1, fout), jnp.float32, -bound, bound)
        return w, b

    w1, b1 = lin(ks[0], ks[1], feature_dim, feature_dim)
    w2, b2 = lin(ks[2], ks[3], inst_in, feature_dim)
    w3, b3 = lin(ks[4], ks[5], feature_dim, inst_emb_dim)
    wc, bc = lin(ks[6], ks[7], feature_dim, num_class)

    # BatchNorm1d eval with default init (gamma=1, beta=0, mean=0, var=1) as scale/shift.
    g = jnp.full((1, feature_dim), 1.0 / jnp.sqrt(1.0 + eps), jnp.float32)
    s = jnp.zeros((1, feature_dim), jnp.float32)

    return dict(w1=w1, b1=b1, g1=g, s1=s,
                w2=w2, b2=b2, g2=g, s2=s,
                w3=w3, b3=b3, wc=wc, bc=bc)


def _ref_e_ins(f_sem, f_ins, p):
    h_sem = jnp.maximum((f_sem @ p["w1"] + p["b1"]) * p["g1"] + p["s1"], 0.0)
    h_ins = jnp.maximum((f_ins @ p["w2"] + p["b2"]) * p["g2"] + p["s2"], 0.0)
    return (h_ins + h_sem) @ p["w3"] + p["b3"]


def _ref_fusion(e_ins, f_sem, batch, p, k, thr):
    d2 = jnp.sum((e_ins[:, None, :] - e_ins[None, :, :]) ** 2, axis=-1)
    same = batch[:, None] == batch[None, :]
    d2m = jnp.where(same, d2, jnp.inf)
    kth = -jax.lax.top_k(-d2m, k)[0][:, -1]
    mask = (d2m <= kth[:, None]) & (d2m <= thr * thr) & same
    f_isem = jnp.max(jnp.where(mask[:, :, None], f_sem[None, :, :], -jnp.inf), axis=1)
    return f_isem @ p["wc"] + p["bc"]


if __name__ == "__main__":
    feature_dim, inst_emb_dim, num_class = 32, 8, 13
    k_nn, distance_threshold, norm_degree = 5, 0.5, 2
    B, P = 2, 8               # 2 graphs of 8 points each
    N = B * P

    root = jax.random.PRNGKey(0)
    k_sem, k_ins, k_par = jax.random.split(root, 3)
    f_sem = jax.random.normal(k_sem, (N, feature_dim), jnp.float32)
    f_ins = jax.random.normal(k_ins, (N, 8), jnp.float32)
    batch = jnp.repeat(jnp.arange(B, dtype=jnp.int32), P)

    params = _make_params(k_par, feature_dim, inst_emb_dim, num_class)

    e_ref = _ref_e_ins(f_sem, f_ins, params)

    # exercise both the VMEM-resident-key path and the streaming-key path
    for resident in (True, False):
        p_sem, e_ins = asis_forward(
            f_sem, f_ins, batch, params,
            k=k_nn, distance_threshold=distance_threshold, norm_degree=norm_degree,
            keys_resident=resident)
        jax.block_until_ready((p_sem, e_ins))

        assert p_sem.shape == (N, num_class) and e_ins.shape == (N, inst_emb_dim)
        assert jnp.allclose(e_ins, e_ref, atol=1e-3), "e_ins mismatch"
        p_ref = _ref_fusion(e_ins, f_sem, batch, params, k_nn, distance_threshold)
        assert jnp.allclose(p_sem, p_ref, atol=1e-3), "p_sem mismatch"

    print("KERNEL_OK")
</pallas_src>

<mosaic_0001>
module attributes {stable_mosaic.version = 11 : i64} {
  func.func @_mlp_kernel(%arg0: i32, %arg1: memref<512x32xf32, #tpu.memory_space<vmem>>, %arg2: memref<512x8xf32, #tpu.memory_space<vmem>>, %arg3: memref<32x32xf32, #tpu.memory_space<vmem>>, %arg4: memref<1x32xf32, #tpu.memory_space<vmem>>, %arg5: memref<8x32xf32, #tpu.memory_space<vmem>>, %arg6: memref<1x32xf32, #tpu.memory_space<vmem>>, %arg7: memref<32x128xf32, #tpu.memory_space<vmem>>, %arg8: memref<1x128xf32, #tpu.memory_space<vmem>>, %arg9: memref<512x128xf32, #tpu.memory_space<vmem>>) attributes {dimension_semantics = [#tpu.dimension_semantics<parallel>], iteration_bounds = array<i64: 1>, scalar_prefetch = 0 : i64, scratch_operands = 0 : i64, tpu.core_type = #tpu.core_type<tc>, window_params = [{transform_indices = @transform_0, window_bounds = array<i64: 512, 32>}, {transform_indices = @transform_1, window_bounds = array<i64: 512, 8>}, {pipeline_mode = #tpu.pipeline_mode<synchronous>, transform_indices = @transform_2, window_bounds = array<i64: 32, 32>}, {pipeline_mode = #tpu.pipeline_mode<synchronous>, transform_indices = @transform_3, window_bounds = array<i64: 1, 32>}, {pipeline_mode = #tpu.pipeline_mode<synchronous>, transform_indices = @transform_4, window_bounds = array<i64: 8, 32>}, {pipeline_mode = #tpu.pipeline_mode<synchronous>, transform_indices = @transform_5, window_bounds = array<i64: 1, 32>}, {pipeline_mode = #tpu.pipeline_mode<synchronous>, transform_indices = @transform_6, window_bounds = array<i64: 32, 128>}, {pipeline_mode = #tpu.pipeline_mode<synchronous>, transform_indices = @transform_7, window_bounds = array<i64: 1, 128>}, {transform_indices = @transform_8, window_bounds = array<i64: 512, 128>}]} {
    %c0 = arith.constant 0 : index
    %c0_0 = arith.constant 0 : index
    %0 = vector.load %arg1[%c0, %c0_0] : memref<512x32xf32, #tpu.memory_space<vmem>>, vector<512x32xf32>
    %c0_1 = arith.constant 0 : index
    %c0_2 = arith.constant 0 : index
    %1 = vector.load %arg3[%c0_1, %c0_2] : memref<32x32xf32, #tpu.memory_space<vmem>>, vector<32x32xf32>
    %cst = arith.constant dense<0.000000e+00> : vector<512x32xf32>
    %2 = tpu.matmul %0, %1, %cst {dimension_numbers = #tpu.dot_dimension_numbers<[1], [0], [0], [1], [0, 0, 1, 1], [], []>} : vector<512x32xf32>, vector<32x32xf32>, vector<512x32xf32> -> vector<512x32xf32>
    %c0_3 = arith.constant 0 : index
    %c0_4 = arith.constant 0 : index
    %3 = vector.load %arg4[%c0_3, %c0_4] : memref<1x32xf32, #tpu.memory_space<vmem>>, vector<1x32xf32>
    %4 = vector.broadcast %3 : vector<1x32xf32> to vector<512x32xf32>
    %5 = arith.addf %2, %4 : vector<512x32xf32>
    %cst_5 = arith.constant 0.000000e+00 : f32
    %6 = vector.broadcast %cst_5 : f32 to vector<512x32xf32>
    %7 = arith.maximumf %5, %6 : vector<512x32xf32>
    %c0_6 = arith.constant 0 : index
    %c0_7 = arith.constant 0 : index
    %8 = vector.load %arg2[%c0_6, %c0_7] : memref<512x8xf32, #tpu.memory_space<vmem>>, vector<512x8xf32>
    %c0_8 = arith.constant 0 : index
    %c0_9 = arith.constant 0 : index
    %9 = vector.load %arg5[%c0_8, %c0_9] : memref<8x32xf32, #tpu.memory_space<vmem>>, vector<8x32xf32>
    %cst_10 = arith.constant dense<0.000000e+00> : vector<512x32xf32>
    %10 = tpu.matmul %8, %9, %cst_10 {dimension_numbers = #tpu.dot_dimension_numbers<[1], [0], [0], [1], [0, 0, 1, 1], [], []>} : vector<512x8xf32>, vector<8x32xf32>, vector<512x32xf32> -> vector<512x32xf32>
    %c0_11 = arith.constant 0 : index
    %c0_12 = arith.constant 0 : index
    %11 = vector.load %arg6[%c0_11, %c0_12] : memref<1x32xf32, #tpu.memory_space<vmem>>, vector<1x32xf32>
    %12 = vector.broadcast %11 : vector<1x32xf32> to vector<512x32xf32>
    %13 = arith.addf %10, %12 : vector<512x32xf32>
    %cst_13 = arith.constant 0.000000e+00 : f32
    %14 = vector.broadcast %cst_13 : f32 to vector<512x32xf32>
    %15 = arith.maximumf %13, %14 : vector<512x32xf32>
    %16 = arith.addf %15, %7 : vector<512x32xf32>
    %c0_14 = arith.constant 0 : index
    %c0_15 = arith.constant 0 : index
    %17 = vector.load %arg7[%c0_14, %c0_15] : memref<32x128xf32, #tpu.memory_space<vmem>>, vector<32x128xf32>
    %cst_16 = arith.constant dense<0.000000e+00> : vector<512x128xf32>
    %18 = tpu.matmul %16, %17, %cst_16 {dimension_numbers = #tpu.dot_dimension_numbers<[1], [0], [0], [1], [0, 0, 1, 1], [], []>} : vector<512x32xf32>, vector<32x128xf32>, vector<512x128xf32> -> vector<512x128xf32>
    %c0_17 = arith.constant 0 : index
    %c0_18 = arith.constant 0 : index
    %19 = vector.load %arg8[%c0_17, %c0_18] : memref<1x128xf32, #tpu.memory_space<vmem>>, vector<1x128xf32>
    %20 = vector.broadcast %19 : vector<1x128xf32> to vector<512x128xf32>
    %21 = arith.addf %18, %20 : vector<512x128xf32>
    %c0_19 = arith.constant 0 : index
    %c0_20 = arith.constant 0 : index
    %22 = vector.load %arg9[%c0_19, %c0_20] : memref<512x128xf32, #tpu.memory_space<vmem>>, vector<512x128xf32>
    tpu.vector_store %arg9[%c0_19, %c0_20], %21 {strides = array<i32>} : memref<512x128xf32, #tpu.memory_space<vmem>>, vector<512x128xf32>,
    return
  }
  func.func @transform_0(%arg0: i32) -> (i32, i32) {
    %c0_i32 = arith.constant 0 : i32
    %c0_i32_0 = arith.constant 0 : i32
    return %arg0, %c0_i32 : i32, i32
  }
  func.func @transform_1(%arg0: i32) -> (i32, i32) {
    %c0_i32 = arith.constant 0 : i32
    %c0_i32_0 = arith.constant 0 : i32
    return %arg0, %c0_i32 : i32, i32
  }
  func.func @transform_2(%arg0: i32) -> (i32, i32) {
    %c0_i32 = arith.constant 0 : i32
    %c0_i32_0 = arith.constant 0 : i32
    %c0_i32_1 = arith.constant 0 : i32
    return %c0_i32, %c0_i32_0 : i32, i32
  }
  func.func @transform_3(%arg0: i32) -> (i32, i32) {
    %c0_i32 = arith.constant 0 : i32
    %c0_i32_0 = arith.constant 0 : i32
    %c0_i32_1 = arith.constant 0 : i32
    return %c0_i32, %c0_i32_0 : i32, i32
  }
  func.func @transform_4(%arg0: i32) -> (i32, i32) {
    %c0_i32 = arith.constant 0 : i32
    %c0_i32_0 = arith.constant 0 : i32
    %c0_i32_1 = arith.constant 0 : i32
    return %c0_i32, %c0_i32_0 : i32, i32
  }
  func.func @transform_5(%arg0: i32) -> (i32, i32) {
    %c0_i32 = arith.constant 0 : i32
    %c0_i32_0 = arith.constant 0 : i32
    %c0_i32_1 = arith.constant 0 : i32
    return %c0_i32, %c0_i32_0 : i32, i32
  }
  func.func @transform_6(%arg0: i32) -> (i32, i32) {
    %c0_i32 = arith.constant 0 : i32
    %c0_i32_0 = arith.constant 0 : i32
    %c0_i32_1 = arith.constant 0 : i32
    return %c0_i32, %c0_i32_0 : i32, i32
  }
  func.func @transform_7(%arg0: i32) -> (i32, i32) {
    %c0_i32 = arith.constant 0 : i32
    %c0_i32_0 = arith.constant 0 : i32
    %c0_i32_1 = arith.constant 0 : i32
    return %c0_i32, %c0_i32_0 : i32, i32
  }
  func.func @transform_8(%arg0: i32) -> (i32, i32) {
    %c0_i32 = arith.constant 0 : i32
    %c0_i32_0 = arith.constant 0 : i32
    return %arg0, %c0_i32 : i32, i32
  }
}

</mosaic_0001>

<bundles_post_ra>
// kernel: tpu_custom_call.1
= control target key start
LH: loop header
LB: loop body
LE: loop exit
PB: predicated region body
PF: predicated region fallthrough
CT: control target
= control target key end

     0   :  { %vm105_vm0 = vcmask 261120   ;;  %vm819_vm1 = vcmask 64512   ;;  %s4095_s0 = inlined_call_operand.vmem [shape: f32[512,32], index: 0, kind: input, shape index: {}]   ;;  %s4096_s1 = inlined_call_operand.vmem [shape: f32[512,8], index: 1, kind: input, shape index: {}]   ;;  %s4097_s2 = inlined_call_operand.vmem [shape: f32[32,32], index: 2, kind: input, shape index: {}]   ;;  %s4098_s3 = inlined_call_operand.vmem [shape: f32[1,32], index: 3, kind: input, shape index: {}]   ;;  %s4099_s4 = inlined_call_operand.vmem [shape: f32[8,32], index: 4, kind: input, shape index: {}]   ;;  %s4100_s5 = inlined_call_operand.vmem [shape: f32[1,32], index: 5, kind: input, shape index: {}]   ;;  %s4101_s6 = inlined_call_operand.vmem [shape: f32[32,128], index: 6, kind: input, shape index: {}]   ;;  %s4102_s7 = inlined_call_operand.vmem [shape: f32[1,128], index: 7, kind: input, shape index: {}]   ;;  %s4103_s8 = inlined_call_operand.hbm [shape: f32[512,128], index: 8, kind: output, shape index: {}]  }
   0x1   :  { %v94_v0 = vld [vmem:[%s4097_s2] sm:$0xff]  ;;  %v95_v1 = vld [vmem:[%s4097_s2 + $0x8] sm:$0xff]  ;;  %v96_v2 = vld [vmem:[%s4097_s2 + $0x10] sm:$0xff] }
   0x2   :  { %v2895_v3 = vpack.c.bf16 %v95_v1, %v94_v0  ;;  %v97_v4 = vld [vmem:[%s4097_s2 + $0x18] sm:$0xff]  ;;  %v30_v5 = vld [vmem:[%s4095_s0] sm:$0xff]  ;;  %v31_v8 = vld [vmem:[%s4095_s0 + $0x8] sm:$0xff] }
   0x3   :  { %v2899_v6 = vpack.c.bf16 %v97_v4, %v96_v2  ;;  %2597 = vmatprep.mubr.msk.f32.mxu0 %vm105_vm0, %v30_v5  ;;  %v811_v7 = vld [vmem:[%s4099_s4] sm:$0xff]  ;;  %v32_v9 = vld [vmem:[%s4095_s0 + $0x10] sm:$0xff]  ;;  %v33_v10 = vld [vmem:[%s4095_s0 + $0x18] sm:$0xff] }
   0x4   :  { %2896 = vmatprep.subr.bf16.mxu0 %v2895_v3  ;;  %2911 = vmatprep.subr.mxu1 %v811_v7  ;;  %v777_v11 = vld [vmem:[%s4096_s1 + $0xf0] sm:$0xff]  ;;  %v778_v12 = vld [vmem:[%s4096_s1 + $0xf8] sm:$0xff]  ;;  %v34_v13 = vld [vmem:[%s4095_s0 + $0x20] sm:$0xff] }
   0x5   :  { %2898 = vmatpush3.bf16.msra.mxu0 %v2895_v3  ;;  %2912 = vmatpush3.msra.mxu1 %v811_v7  ;;  %v779_v14 = vld [vmem:[%s4096_s1 + $0x100] sm:$0xff]  ;;  %v780_v15 = vld [vmem:[%s4096_s1 + $0x108] sm:$0xff]  ;;  %v781_v17 = vld [vmem:[%s4096_s1 + $0x110] sm:$0xff] }
   0x6   :  { %2900 = vmatprep.subr.bf16.mxu0 %v2899_v6  ;;  %2740 = vmatprep.mubr.msk.f32.mxu1 %vm819_vm1, %v777_v11  ;;  %v35_v16 = vld [vmem:[%s4095_s0 + $0x28] sm:$0xff]  ;;  %v36_v18 = vld [vmem:[%s4095_s0 + $0x30] sm:$0xff]  ;;  %v782_v19 = vld [vmem:[%s4096_s1 + $0x118] sm:$0xff] }
   0x7   :  { %2741 = vmatmul.mubr.msk.f32.vlgmr.msra.gmra.mrb[0].mxu1 %vm819_vm1, %v778_v12  ;;  %v37_v20 = vld [vmem:[%s4095_s0 + $0x38] sm:$0xff]  ;;  %v783_v21 = vld [vmem:[%s4096_s1 + $0x120] sm:$0xff]  ;;  %v784_v23 = vld [vmem:[%s4096_s1 + $0x128] sm:$0xff] }
   0x8   :  { %2743 = vmatprep.mubr.msk.f32.mxu1 %vm819_vm1, %v779_v14  ;;  %v38_v22 = vld [vmem:[%s4095_s0 + $0x40] sm:$0xff]  ;;  %v39_v24 = vld [vmem:[%s4095_s0 + $0x48] sm:$0xff]  ;;  %v785_v25 = vld [vmem:[%s4096_s1 + $0x130] sm:$0xff] }
   0x9   :  { %2902 = vmatpush3.bf16.msra.mxu0 %v2899_v6  ;;  %v40_v26 = vld [vmem:[%s4095_s0 + $0x50] sm:$0xff]  ;;  %v786_v27 = vld [vmem:[%s4096_s1 + $0x138] sm:$0xff]  ;;  %v787_v29 = vld [vmem:[%s4096_s1 + $0x140] sm:$0xff] }
   0xa   :  { %2693 = vmatprep.subr.mxu0 %v811_v7  ;;  %v41_v28 = vld [vmem:[%s4095_s0 + $0x58] sm:$0xff]  ;;  %v42_v30 = vld [vmem:[%s4095_s0 + $0x60] sm:$0xff]  ;;  %v788_v31 = vld [vmem:[%s4096_s1 + $0x148] sm:$0xff] }
   0xb   :  { %2744 = vmatmul.mubr.msk.f32.gmra.mrb[2].mxu1 %vm819_vm1, %v780_v15  ;;  %v43_v32 = vld [vmem:[%s4095_s0 + $0x68] sm:$0xff]  ;;  %v789_v33 = vld [vmem:[%s4096_s1 + $0x150] sm:$0xff]  ;;  %v790_v35 = vld [vmem:[%s4096_s1 + $0x158] sm:$0xff] }
   0xc   :  { %2598 = vmatmul.mubr.msk.f32.vlgmr.msra.gmra.mrb[0].mxu0 %vm105_vm0, %v31_v8  ;;  %2746 = vmatprep.mubr.msk.f32.mxu1 %vm819_vm1, %v781_v17  ;;  %v44_v34 = vld [vmem:[%s4095_s0 + $0x70] sm:$0xff]  ;;  %v45_v36 = vld [vmem:[%s4095_s0 + $0x78] sm:$0xff]  ;;  %v791_v37 = vld [vmem:[%s4096_s1 + $0x160] sm:$0xff] }
   0xd   :  { %2694 = vmatpush3.msra.mxu0 %v811_v7  ;;  %2600 = vmatprep.mubr.msk.f32.mxu0 %vm105_vm0, %v32_v9  ;;  %v46_v38 = vld [vmem:[%s4095_s0 + $0x80] sm:$0xff]  ;;  %v792_v39 = vld [vmem:[%s4096_s1 + $0x168] sm:$0xff]  ;;  %v793_v41 = vld [vmem:[%s4096_s1 + $0x170] sm:$0xff] }
   0xe   :  { %v47_v40 = vld [vmem:[%s4095_s0 + $0x88] sm:$0xff] }
   0xf   :  { %2747 = vmatmul.mubr.msk.f32.gmra.mrb[4].mxu1 %vm819_vm1, %v782_v19 }
  0x10   :  { %2601 = vmatmul.mubr.msk.f32.gmra.mrb[2].mxu0 %vm105_vm0, %v33_v10  ;;  %2749 = vmatprep.mubr.msk.f32.mxu1 %vm819_vm1, %v783_v21 }
  0x11   :  { %2603 = vmatprep.mubr.msk.f32.mxu0 %vm105_vm0, %v34_v13 }
  0x13   :  { %2750 = vmatmul.mubr.msk.f32.gmra.mrb[6].mxu1 %vm819_vm1, %v784_v23 }
  0x14   :  { %2604 = vmatmul.mubr.msk.f32.gmra.mrb[4].mxu0 %vm105_vm0, %v35_v16  ;;  %2752 = vmatprep.mubr.msk.f32.mxu1 %vm819_vm1, %v785_v25 }
  0x15   :  { %2606 = vmatprep.mubr.msk.f32.mxu0 %vm105_vm0, %v36_v18 }
  0x17   :  { %2753 = vmatmul.mubr.msk.f32.gmra.mrb[8].mxu1 %vm819_vm1, %v786_v27 }
  0x18   :  { %2607 = vmatmul.mubr.msk.f32.gmra.mrb[6].mxu0 %vm105_vm0, %v37_v20  ;;  %2755 = vmatprep.mubr.msk.f32.mxu1 %vm819_vm1, %v787_v29 }
  0x19   :  { %2609 = vmatprep.mubr.msk.f32.mxu0 %vm105_vm0, %v38_v22 }
  0x1b   :  { %2756 = vmatmul.mubr.msk.f32.gmra.mrb[10].mxu1 %vm819_vm1, %v788_v31 }
  0x1c   :  { %2610 = vmatmul.mubr.msk.f32.gmra.mrb[8].mxu0 %vm105_vm0, %v39_v24  ;;  %2758 = vmatprep.mubr.msk.f32.mxu1 %vm819_vm1, %v789_v33 }
  0x1d   :  { %2612 = vmatprep.mubr.msk.f32.mxu0 %vm105_vm0, %v40_v26 }
  0x1f   :  { %2759 = vmatmul.mubr.msk.f32.gmra.mrb[12].mxu1 %vm819_vm1, %v790_v35 }
  0x20   :  { %2613 = vmatmul.mubr.msk.f32.gmra.mrb[10].mxu0 %vm105_vm0, %v41_v28  ;;  %2761 = vmatprep.mubr.msk.f32.mxu1 %vm819_vm1, %v791_v37 }
  0x21   :  { %2615 = vmatprep.mubr.msk.f32.mxu0 %vm105_vm0, %v42_v30 }
  0x24   :  { %2616 = vmatmul.mubr.msk.f32.gmra.mrb[12].mxu0 %vm105_vm0, %v43_v32 }
  0x25   :  { %2618 = vmatprep.mubr.msk.f32.mxu0 %vm105_vm0, %v44_v34 }
  0x28   :  { %2619 = vmatmul.mubr.msk.f32.gmra.mrb[14].mxu0 %vm105_vm0, %v45_v36 }
  0x29   :  { %2621 = vmatprep.mubr.msk.f32.mxu0 %vm105_vm0, %v46_v38 }
  0x2a   :  { %13 = vsyncpa [#allocation3], 0  ;;  %v48_v42 = vld [vmem:[%s4095_s0 + $0x90] sm:$0xff]  ;;  %2762 = vmatmul.mubr.msk.f32.gmra.mrb[14].mxu1 %vm819_vm1, %v792_v39  ;;  %v794_v43 = vld [vmem:[%s4096_s1 + $0x178] sm:$0xff] }
  0x2b   :  { %2764 = vmatprep.mubr.msk.f32.mxu1 %vm819_vm1, %v793_v41  ;;  %v49_v44 = vld [vmem:[%s4095_s0 + $0x98] sm:$0xff]  ;;  %v795_v45 = vld [vmem:[%s4096_s1 + $0x180] sm:$0xff]  ;;  %v796_v47 = vld [vmem:[%s4096_s1 + $0x188] sm:$0xff] }
  0x2c   :  { %2622 = vmatmul.mubr.msk.f32.gmra.mrb[16].mxu0 %vm105_vm0, %v47_v40  ;;  %v50_v46 = vld [vmem:[%s4095_s0 + $0xa0] sm:$0xff]  ;;  %v51_v48 = vld [vmem:[%s4095_s0 + $0xa8] sm:$0xff]  ;;  %v797_v49 = vld [vmem:[%s4096_s1 + $0x190] sm:$0xff] }
  0x2d   :  { %2624 = vmatprep.mubr.msk.f32.mxu0 %vm105_vm0, %v48_v42  ;;  %v52_v50 = vld [vmem:[%s4095_s0 + $0xb0] sm:$0xff]  ;;  %v798_v51 = vld [vmem:[%s4096_s1 + $0x198] sm:$0xff]  ;;  %v799_v53 = vld [vmem:[%s4096_s1 + $0x1a0] sm:$0xff] }
  0x2e   :  { %2765 = vmatmul.mubr.msk.f32.gmra.mrb[16].mxu1 %vm819_vm1, %v794_v43  ;;  %v53_v52 = vld [vmem:[%s4095_s0 + $0xb8] sm:$0xff]  ;;  %v54_v54 = vld [vmem:[%s4095_s0 + $0xc0] sm:$0xff]  ;;  %v800_v55 = vld [vmem:[%s4096_s1 + $0x1a8] sm:$0xff] }
  0x2f   :  { %2767 = vmatprep.mubr.msk.f32.mxu1 %vm819_vm1, %v795_v45  ;;  %v55_v56 = vld [vmem:[%s4095_s0 + $0xc8] sm:$0xff]  ;;  %v801_v57 = vld [vmem:[%s4096_s1 + $0x1b0] sm:$0xff]  ;;  %v802_v59 = vld [vmem:[%s4096_s1 + $0x1b8] sm:$0xff] }
  0x30   :  { %2625 = vmatmul.mubr.msk.f32.gmra.mrb[18].mxu0 %vm105_vm0, %v49_v44  ;;  %v56_v58 = vld [vmem:[%s4095_s0 + $0xd0] sm:$0xff]  ;;  %v57_v60 = vld [vmem:[%s4095_s0 + $0xd8] sm:$0xff]  ;;  %v803_v61 = vld [vmem:[%s4096_s1 + $0x1c0] sm:$0xff] }
  0x31   :  { %2627 = vmatprep.mubr.msk.f32.mxu0 %vm105_vm0, %v50_v46  ;;  %v58_v62 = vld [vmem:[%s4095_s0 + $0xe0] sm:$0xff]  ;;  %v804_v63 = vld [vmem:[%s4096_s1 + $0x1c8] sm:$0xff]  ;;  %v805_v1 = vld [vmem:[%s4096_s1 + $0x1d0] sm:$0xff] }
  0x32   :  { %2768 = vmatmul.mubr.msk.f32.gmra.mrb[18].mxu1 %vm819_vm1, %v796_v47  ;;  %v59_v0 = vld [vmem:[%s4095_s0 + $0xe8] sm:$0xff]  ;;  %v60_v2 = vld [vmem:[%s4095_s0 + $0xf0] sm:$0xff]  ;;  %v806_v3 = vld [vmem:[%s4096_s1 + $0x1d8] sm:$0xff] }
  0x33   :  { %2770 = vmatprep.mubr.msk.f32.mxu1 %vm819_vm1, %v797_v49  ;;  %v61_v4 = vld [vmem:[%s4095_s0 + $0xf8] sm:$0xff]  ;;  %v807_v5 = vld [vmem:[%s4096_s1 + $0x1e0] sm:$0xff]  ;;  %v808_v7 = vld [vmem:[%s4096_s1 + $0x1e8] sm:$0xff] }
  0x34   :  { %2628 = vmatmul.mubr.msk.f32.gmra.mrb[20].mxu0 %vm105_vm0, %v51_v48  ;;  %v62_v6 = vld [vmem:[%s4095_s0 + $0x100] sm:$0xff]  ;;  %v63_v8 = vld [vmem:[%s4095_s0 + $0x108] sm:$0xff]  ;;  %v809_v9 = vld [vmem:[%s4096_s1 + $0x1f0] sm:$0xff] }
  0x35   :  { %2630 = vmatprep.mubr.msk.f32.mxu0 %vm105_vm0, %v52_v50  ;;  %v64_v10 = vld [vmem:[%s4095_s0 + $0x110] sm:$0xff]  ;;  %v810_v11 = vld [vmem:[%s4096_s1 + $0x1f8] sm:$0xff]  ;;  %v66_v13 = vld [vmem:[%s4095_s0 + $0x120] sm:$0xff] }
  0x36   :  { %2771 = vmatmul.mubr.msk.f32.gmra.mrb[20].mxu1 %vm819_vm1, %v798_v51  ;;  %v65_v12 = vld [vmem:[%s4095_s0 + $0x118] sm:$0xff]  ;;  %v67_v14 = vld [vmem:[%s4095_s0 + $0x128] sm:$0xff]  ;;  %v68_v15 = vld [vmem:[%s4095_s0 + $0x130] sm:$0xff] }
  0x37   :  { %2773 = vmatprep.mubr.msk.f32.mxu1 %vm819_vm1, %v799_v53  ;;  %v69_v16 = vld [vmem:[%s4095_s0 + $0x138] sm:$0xff]  ;;  %v70_v17 = vld [vmem:[%s4095_s0 + $0x140] sm:$0xff]  ;;  %v71_v18 = vld [vmem:[%s4095_s0 + $0x148] sm:$0xff] }
  0x38   :  { %2631 = vmatmul.mubr.msk.f32.gmra.mrb[22].mxu0 %vm105_vm0, %v53_v52  ;;  %v72_v19 = vld [vmem:[%s4095_s0 + $0x150] sm:$0xff]  ;;  %v73_v20 = vld [vmem:[%s4095_s0 + $0x158] sm:$0xff]  ;;  %v74_v21 = vld [vmem:[%s4095_s0 + $0x160] sm:$0xff] }
  0x39   :  { %2633 = vmatprep.mubr.msk.f32.mxu0 %vm105_vm0, %v54_v54  ;;  %v75_v22 = vld [vmem:[%s4095_s0 + $0x168] sm:$0xff]  ;;  %v76_v23 = vld [vmem:[%s4095_s0 + $0x170] sm:$0xff]  ;;  %v77_v24 = vld [vmem:[%s4095_s0 + $0x178] sm:$0xff] }
  0x3a   :  { %2774 = vmatmul.mubr.msk.f32.gmra.mrb[22].mxu1 %vm819_vm1, %v800_v55  ;;  %v78_v25 = vld [vmem:[%s4095_s0 + $0x180] sm:$0xff]  ;;  %v79_v26 = vld [vmem:[%s4095_s0 + $0x188] sm:$0xff]  ;;  %v80_v27 = vld [vmem:[%s4095_s0 + $0x190] sm:$0xff] }
  0x3b   :  { %2776 = vmatprep.mubr.msk.f32.mxu1 %vm819_vm1, %v801_v57  ;;  %v81_v28 = vld [vmem:[%s4095_s0 + $0x198] sm:$0xff]  ;;  %v82_v29 = vld [vmem:[%s4095_s0 + $0x1a0] sm:$0xff]  ;;  %v83_v30 = vld [vmem:[%s4095_s0 + $0x1a8] sm:$0xff] }
  0x3c   :  { %2634 = vmatmul.mubr.msk.f32.gmra.mrb[24].mxu0 %vm105_vm0, %v55_v56  ;;  %v84_v31 = vld [vmem:[%s4095_s0 + $0x1b0] sm:$0xff]  ;;  %v85_v32 = vld [vmem:[%s4095_s0 + $0x1b8] sm:$0xff]  ;;  %v86_v33 = vld [vmem:[%s4095_s0 + $0x1c0] sm:$0xff] }
  0x3d   :  { %2636 = vmatprep.mubr.msk.f32.mxu0 %vm105_vm0, %v56_v58  ;;  %v87_v34 = vld [vmem:[%s4095_s0 + $0x1c8] sm:$0xff]  ;;  %v88_v35 = vld [vmem:[%s4095_s0 + $0x1d0] sm:$0xff]  ;;  %v89_v36 = vld [vmem:[%s4095_s0 + $0x1d8] sm:$0xff] }
  0x3e   :  { %2777 = vmatmul.mubr.msk.f32.gmra.mrb[24].mxu1 %vm819_vm1, %v802_v59  ;;  %v90_v37 = vld [vmem:[%s4095_s0 + $0x1e0] sm:$0xff]  ;;  %v91_v38 = vld [vmem:[%s4095_s0 + $0x1e8] sm:$0xff]  ;;  %v92_v39 = vld [vmem:[%s4095_s0 + $0x1f0] sm:$0xff] }
  0x3f   :  { %2779 = vmatprep.mubr.msk.f32.mxu1 %vm819_vm1, %v803_v61  ;;  %v93_v40 = vld [vmem:[%s4095_s0 + $0x1f8] sm:$0xff]  ;;  %v747_v41 = vld [vmem:[%s4096_s1] sm:$0xff]  ;;  %v748_v42 = vld [vmem:[%s4096_s1 + $0x8] sm:$0xff] }
  0x40   :  { %2637 = vmatmul.mubr.msk.f32.gmra.mrb[26].mxu0 %vm105_vm0, %v57_v60  ;;  %v749_v43 = vld [vmem:[%s4096_s1 + $0x10] sm:$0xff]  ;;  %v750_v44 = vld [vmem:[%s4096_s1 + $0x18] sm:$0xff]  ;;  %v751_v45 = vld [vmem:[%s4096_s1 + $0x20] sm:$0xff] }
  0x41   :  { %2639 = vmatprep.mubr.msk.f32.mxu0 %vm105_vm0, %v58_v62  ;;  %v752_v46 = vld [vmem:[%s4096_s1 + $0x28] sm:$0xff]  ;;  %v753_v47 = vld [vmem:[%s4096_s1 + $0x30] sm:$0xff]  ;;  %v754_v48 = vld [vmem:[%s4096_s1 + $0x38] sm:$0xff] }
  0x42   :  { %2780 = vmatmul.mubr.msk.f32.gmra.mrb[26].mxu1 %vm819_vm1, %v804_v63  ;;  %v755_v49 = vld [vmem:[%s4096_s1 + $0x40] sm:$0xff]  ;;  %v756_v50 = vld [vmem:[%s4096_s1 + $0x48] sm:$0xff]  ;;  %v757_v51 = vld [vmem:[%s4096_s1 + $0x50] sm:$0xff] }
  0x43   :  { %2782 = vmatprep.mubr.msk.f32.mxu1 %vm819_vm1, %v805_v1  ;;  %v758_v52 = vld [vmem:[%s4096_s1 + $0x58] sm:$0xff]  ;;  %v759_v53 = vld [vmem:[%s4096_s1 + $0x60] sm:$0xff]  ;;  %v760_v54 = vld [vmem:[%s4096_s1 + $0x68] sm:$0xff] }
  0x44   :  { %2640 = vmatmul.mubr.msk.f32.gmra.mrb[28].mxu0 %vm105_vm0, %v59_v0  ;;  %v761_v55 = vld [vmem:[%s4096_s1 + $0x70] sm:$0xff]  ;;  %v762_v56 = vld [vmem:[%s4096_s1 + $0x78] sm:$0xff]  ;;  %v763_v57 = vld [vmem:[%s4096_s1 + $0x80] sm:$0xff] }
  0x45   :  { %2642 = vmatprep.mubr.msk.f32.mxu0 %vm105_vm0, %v60_v2  ;;  %v764_v58 = vld [vmem:[%s4096_s1 + $0x88] sm:$0xff]  ;;  %v1525_v59 = vld [vmem:[%s4101_s6] sm:$0xff]  ;;  %v765_v61 = vld [vmem:[%s4096_s1 + $0x90] sm:$0xff] }
  0x46   :  { %2783 = vmatmul.mubr.msk.f32.gmra.mrb[28].mxu1 %vm819_vm1, %v806_v3  ;;  %v1526_v60 = vld [vmem:[%s4101_s6 + $0x8] sm:$0xff]  ;;  %v766_v63 = vld [vmem:[%s4096_s1 + $0x98] sm:$0xff]  ;;  %v767_v0 = vld [vmem:[%s4096_s1 + $0xa0] sm:$0xff] }
  0x47   :  { %2785 = vmatprep.mubr.msk.f32.mxu1 %vm819_vm1, %v807_v5  ;;  %v2903_v62 = vpack.c.bf16 %v1526_v60, %v1525_v59  ;;  %v768_v1 = vld [vmem:[%s4096_s1 + $0xa8] sm:$0xff]  ;;  %v769_v2 = vld [vmem:[%s4096_s1 + $0xb0] sm:$0xff]  ;;  %v770_v3 = vld [vmem:[%s4096_s1 + $0xb8] sm:$0xff] }
  0x48   :  { %2643 = vmatmul.mubr.msk.f32.gmra.mrb[30].mxu0 %vm105_vm0, %v61_v4  ;;  %v771_v4 = vld [vmem:[%s4096_s1 + $0xc0] sm:$0xff]  ;;  %v772_v5 = vld [vmem:[%s4096_s1 + $0xc8] sm:$0xff] }
  0x49   :  { %2645 = vmatprep.mubr.msk.f32.mxu0 %vm105_vm0, %v62_v6  ;;  %2904 = vmatprep.subr.bf16.mxu1 %v2903_v62  ;;  %v773_v6 = vld [vmem:[%s4096_s1 + $0xd0] sm:$0xff] }
  0x4a   :  { %2786 = vmatmul.mubr.msk.f32.gmra.mrb[30].mxu1 %vm819_vm1, %v808_v7  ;;  %v774_v7 = vld [vmem:[%s4096_s1 + $0xd8] sm:$0xff] }
  0x4b   :  { %2788 = vmatprep.mubr.msk.f32.mxu1 %vm819_vm1, %v809_v9  ;;  %2906 = vmatpush3.bf16.msra.mxu1 %v2903_v62  ;;  %v776_v9 = vld [vmem:[%s4096_s1 + $0xe8] sm:$0xff] }
  0x4c   :  { %2646 = vmatmul.mubr.msk.f32.gmra.mrb[32].mxu0 %vm105_vm0, %v63_v8  ;;  %v775_v8 = vld [vmem:[%s4096_s1 + $0xe0] sm:$0xff] }
  0x4d   :  { %2648 = vmatprep.mubr.msk.f32.mxu0 %vm105_vm0, %v64_v10  ;;  %v1527_v10 = vld [vmem:[%s4101_s6 + $0x10] sm:$0xff] }
  0x4e   :  { %2789 = vmatmul.mubr.msk.f32.gmra.mrb[32].mxu1 %vm819_vm1, %v810_v11  ;;  %v1528_v11 = vld [vmem:[%s4101_s6 + $0x18] sm:$0xff] }
  0x50   :  { %2649 = vmatmul.mubr.msk.f32.gmra.mrb[34].mxu0 %vm105_vm0, %v65_v12  ;;  %v2907_v12 = vpack.c.bf16 %v1528_v11, %v1527_v10  ;;  %v3649_v11 = vld [vmem:[%s4098_s3] ss:$0 sm:$0xff] }
  0x51   :  { %2651 = vmatprep.mubr.msk.f32.mxu0 %vm105_vm0, %v66_v13 }
  0x52   :  { %2908 = vmatprep.subr.bf16.mxu1 %v2907_v12 }
  0x53   :  { %2910 = vmatpush3.bf16.msra.mxu1 %v2907_v12 }
  0x54   :  { %2652 = vmatmul.mubr.msk.f32.gmra.mrb[36].mxu0 %vm105_vm0, %v67_v14 }
  0x55   :  { %2654 = vmatprep.mubr.msk.f32.mxu0 %vm105_vm0, %v68_v15 }
  0x58   :  { %2655 = vmatmul.mubr.msk.f32.gmra.mrb[38].mxu0 %vm105_vm0, %v69_v16 }
  0x59   :  { %2657 = vmatprep.mubr.msk.f32.mxu0 %vm105_vm0, %v70_v17 }
  0x5c   :  { %2658 = vmatmul.mubr.msk.f32.gmra.mrb[40].mxu0 %vm105_vm0, %v71_v18 }
  0x5d   :  { %2660 = vmatprep.mubr.msk.f32.mxu0 %vm105_vm0, %v72_v19 }
  0x60   :  { %2661 = vmatmul.mubr.msk.f32.gmra.mrb[42].mxu0 %vm105_vm0, %v73_v20 }
  0x61   :  { %2663 = vmatprep.mubr.msk.f32.mxu0 %vm105_vm0, %v74_v21 }
  0x64   :  { %2664 = vmatmul.mubr.msk.f32.gmra.mrb[44].mxu0 %vm105_vm0, %v75_v22 }
  0x65   :  { %2666 = vmatprep.mubr.msk.f32.mxu0 %vm105_vm0, %v76_v23 }
  0x68   :  { %2667 = vmatmul.mubr.msk.f32.gmra.mrb[46].mxu0 %vm105_vm0, %v77_v24 }
  0x69   :  { %2669 = vmatprep.mubr.msk.f32.mxu0 %vm105_vm0, %v78_v25 }
  0x6c   :  { %2670 = vmatmul.mubr.msk.f32.gmra.mrb[48].mxu0 %vm105_vm0, %v79_v26 }
  0x6d   :  { %2672 = vmatprep.mubr.msk.f32.mxu0 %vm105_vm0, %v80_v27 }
  0x70   :  { %2673 = vmatmul.mubr.msk.f32.gmra.mrb[50].mxu0 %vm105_vm0, %v81_v28 }
  0x71   :  { %2675 = vmatprep.mubr.msk.f32.mxu0 %vm105_vm0, %v82_v29 }
  0x74   :  { %2676 = vmatmul.mubr.msk.f32.gmra.mrb[52].mxu0 %vm105_vm0, %v83_v30 }
  0x75   :  { %2678 = vmatprep.mubr.msk.f32.mxu0 %vm105_vm0, %v84_v31 }
  0x78   :  { %2679 = vmatmul.mubr.msk.f32.gmra.mrb[54].mxu0 %vm105_vm0, %v85_v32 }
  0x79   :  { %2681 = vmatprep.mubr.msk.f32.mxu0 %vm105_vm0, %v86_v33 }
  0x7c   :  { %2682 = vmatmul.mubr.msk.f32.gmra.mrb[56].mxu0 %vm105_vm0, %v87_v34 }
  0x7d   :  { %2684 = vmatprep.mubr.msk.f32.mxu0 %vm105_vm0, %v88_v35 }
  0x80   :  { %2685 = vmatmul.mubr.msk.f32.gmra.mrb[58].mxu0 %vm105_vm0, %v89_v36 }
  0x81   :  { %2687 = vmatprep.mubr.msk.f32.mxu0 %vm105_vm0, %v90_v37 }
  0x84   :  { %2688 = vmatmul.mubr.msk.f32.gmra.mrb[60].mxu0 %vm105_vm0, %v91_v38 }
  0x85   :  { %2690 = vmatprep.mubr.msk.f32.mxu0 %vm105_vm0, %v92_v39 }
  0x88   :  { %2691 = vmatmul.mubr.msk.f32.gmra.mrb[62].mxu0 %vm105_vm0, %v93_v40 }
  0x89   :  { %2695 = vmatprep.mubr.msk.f32.mxu0 %vm819_vm1, %v747_v41 }
  0x8c   :  { %2696 = vmatmul.mubr.msk.f32.vlgmr.msra.gmra.mrb[64].mxu0 %vm819_vm1, %v748_v42 }
  0x8d   :  { %2698 = vmatprep.mubr.msk.f32.mxu0 %vm819_vm1, %v749_v43 }
  0x90   :  { %2699 = vmatmul.mubr.msk.f32.gmra.mrb[66].mxu0 %vm819_vm1, %v750_v44 }
  0x91   :  { %2701 = vmatprep.mubr.msk.f32.mxu0 %vm819_vm1, %v751_v45 }
  0x94   :  { %2702 = vmatmul.mubr.msk.f32.gmra.mrb[68].mxu0 %vm819_vm1, %v752_v46 }
  0x95   :  { %2704 = vmatprep.mubr.msk.f32.mxu0 %vm819_vm1, %v753_v47 }
  0x98   :  { %2705 = vmatmul.mubr.msk.f32.gmra.mrb[70].mxu0 %vm819_vm1, %v754_v48 }
  0x99   :  { %2707 = vmatprep.mubr.msk.f32.mxu0 %vm819_vm1, %v755_v49 }
  0x9c   :  { %2708 = vmatmul.mubr.msk.f32.gmra.mrb[72].mxu0 %vm819_vm1, %v756_v50 }
  0x9d   :  { %2710 = vmatprep.mubr.msk.f32.mxu0 %vm819_vm1, %v757_v51 }
  0xa0   :  { %2711 = vmatmul.mubr.msk.f32.gmra.mrb[74].mxu0 %vm819_vm1, %v758_v52 }
  0xa1   :  { %2713 = vmatprep.mubr.msk.f32.mxu0 %vm819_vm1, %v759_v53 }
  0xa4   :  { %2714 = vmatmul.mubr.msk.f32.gmra.mrb[76].mxu0 %vm819_vm1, %v760_v54 }
  0xa5   :  { %2716 = vmatprep.mubr.msk.f32.mxu0 %vm819_vm1, %v761_v55 }
  0xa8   :  { %2717 = vmatmul.mubr.msk.f32.gmra.mrb[78].mxu0 %vm819_vm1, %v762_v56 }
  0xa9   :  { %2719 = vmatprep.mubr.msk.f32.mxu0 %vm819_vm1, %v763_v57 }
  0xac   :  { %2720 = vmatmul.mubr.msk.f32.gmra.mrb[80].mxu0 %vm819_vm1, %v764_v58 }
  0xad   :  { %2722 = vmatprep.mubr.msk.f32.mxu0 %vm819_vm1, %v765_v61 }
  0xb0   :  { %2723 = vmatmul.mubr.msk.f32.gmra.mrb[82].mxu0 %vm819_vm1, %v766_v63 }
  0xb1   :  { %2725 = vmatprep.mubr.msk.f32.mxu0 %vm819_vm1, %v767_v0 }
  0xb4   :  { %2726 = vmatmul.mubr.msk.f32.gmra.mrb[84].mxu0 %vm819_vm1, %v768_v1 }
  0xb5   :  { %2728 = vmatprep.mubr.msk.f32.mxu0 %vm819_vm1, %v769_v2 }
  0xb8   :  { %2729 = vmatmul.mubr.msk.f32.gmra.mrb[86].mxu0 %vm819_vm1, %v770_v3  ;;  %v3632_v3 = vld [vmem:[%s4100_s5] ss:$0 sm:$0xff] }
  0xb9   :  { %2731 = vmatprep.mubr.msk.f32.mxu0 %vm819_vm1, %v771_v4 }
  0xbc   :  { %2732 = vmatmul.mubr.msk.f32.gmra.mrb[88].mxu0 %vm819_vm1, %v772_v5 }
  0xbd   :  { %2734 = vmatprep.mubr.msk.f32.mxu0 %vm819_vm1, %v773_v6 }
  0xc0   :  { %2735 = vmatmul.mubr.msk.f32.gmra.mrb[90].mxu0 %vm819_vm1, %v774_v7 }
  0xc1   :  { %2737 = vmatprep.mubr.msk.f32.mxu0 %vm819_vm1, %v775_v8 }
  0xc4   :  { %2738 = vmatmul.mubr.msk.f32.gmra.mrb[92].mxu0 %vm819_vm1, %v776_v9 }
  0xda   :  { %v2742_v15 = vpop.f32.mrb[0].mxu1 }
  0xdb   :  { %v1228_v17 = vpop.f32.mrb[1].mxu1  ;;  %v1234_v8 = vadd.f32 %v2742_v15, %v3632_v3 }
  0xdc   :  { %v1229_v9 = vadd.f32 %v3632_v3, %v1228_v17 }
  0xde   :  { %v2745_v19 = vpop.f32.mrb[2].mxu1 }
  0xdf   :  { %v3527_v13 = vpop.f32.mrb[0].mxu0  ;;  %v3537_v21 = vpop.f32.mrb[3].mxu1 }
  0xe0   :  { %v3529_v14 = vpop.f32.mrb[1].mxu0  ;;  %v1239_v17 = vadd.f32 %v3632_v3, %v3537_v21 }
  0xe2   :  { %v3541_v23 = vpop.f32.mrb[4].mxu1 }
  0xe3   :  { %v3531_v16 = vpop.f32.mrb[2].mxu0  ;;  %v3545_v25 = vpop.f32.mrb[5].mxu1 }
  0xe4   :  { %v3533_v18 = vpop.f32.mrb[3].mxu0 }
  0xe6   :  { %v3549_v27 = vpop.f32.mrb[6].mxu1 }
  0xe7   :  { %v3535_v20 = vpop.f32.mrb[4].mxu0  ;;  %v3553_v29 = vpop.f32.mrb[7].mxu1 }
  0xe8   :  { %v3539_v22 = vpop.f32.mrb[5].mxu0 }
  0xea   :  { %v3557_v31 = vpop.f32.mrb[8].mxu1 }
  0xeb   :  { %v3543_v24 = vpop.f32.mrb[6].mxu0  ;;  %v3561_v33 = vpop.f32.mrb[9].mxu1 }
  0xec   :  { %v3547_v26 = vpop.f32.mrb[7].mxu0 }
  0xee   :  { %v3565_v35 = vpop.f32.mrb[10].mxu1 }
  0xef   :  { %v3551_v28 = vpop.f32.mrb[8].mxu0  ;;  %v3569_v37 = vpop.f32.mrb[11].mxu1 }
  0xf0   :  { %v3555_v30 = vpop.f32.mrb[9].mxu0 }
  0xf2   :  { %v3573_v39 = vpop.f32.mrb[12].mxu1 }
  0xf3   :  { %v3559_v32 = vpop.f32.mrb[10].mxu0  ;;  %v3577_v41 = vpop.f32.mrb[13].mxu1 }
  0xf4   :  { %v3563_v34 = vpop.f32.mrb[11].mxu0 }
  0xf7   :  { %v3567_v36 = vpop.f32.mrb[12].mxu0 }
  0xf8   :  { %v3571_v38 = vpop.f32.mrb[13].mxu0 }
  0xfb   :  { %v3575_v40 = vpop.f32.mrb[14].mxu0 }
  0xfc   :  { %v3579_v42 = vpop.f32.mrb[15].mxu0 }
  0xfd   :  { %4104 = vst [vmem:[#allocation5_spill] sm:$0xff] %v3579_v42  ;;  %v3581_v43 = vpop.f32.mrb[14].mxu1 }
  0xfe   :  { %v3585_v45 = vpop.f32.mrb[15].mxu1 }
  0xff   :  { %v3583_v44 = vpop.f32.mrb[16].mxu0 }
 0x100   :  { %4105 = vst [vmem:[#allocation6_spill] sm:$0xff] %v3583_v44  ;;  %v3587_v46 = vpop.f32.mrb[17].mxu0 }
 0x101   :  { %4106 = vst [vmem:[#allocation7_spill] sm:$0xff] %v3587_v46  ;;  %v3589_v47 = vpop.f32.mrb[16].mxu1 }
 0x102   :  { %v3593_v49 = vpop.f32.mrb[17].mxu1 }
 0x103   :  { %v3591_v48 = vpop.f32.mrb[18].mxu0 }
 0x104   :  { %4107 = vst [vmem:[#allocation8_spill] sm:$0xff] %v3591_v48  ;;  %v3595_v50 = vpop.f32.mrb[19].mxu0 }
 0x105   :  { %4108 = vst [vmem:[#allocation9_spill] sm:$0xff] %v3595_v50  ;;  %v3597_v51 = vpop.f32.mrb[18].mxu1 }
 0x106   :  { %v3601_v53 = vpop.f32.mrb[19].mxu1 }
 0x107   :  { %v3599_v52 = vpop.f32.mrb[20].mxu0 }
 0x108   :  { %4109 = vst [vmem:[#allocation10_spill] sm:$0xff] %v3599_v52  ;;  %v3603_v54 = vpop.f32.mrb[21].mxu0 }
 0x109   :  { %4110 = vst [vmem:[#allocation11_spill] sm:$0xff] %v3603_v54  ;;  %v3605_v55 = vpop.f32.mrb[20].mxu1 }
 0x10a   :  { %v3609_v57 = vpop.f32.mrb[21].mxu1 }
 0x10b   :  { %v3607_v56 = vpop.f32.mrb[22].mxu0 }
 0x10c   :  { %4111 = vst [vmem:[#allocation12_spill] sm:$0xff] %v3607_v56  ;;  %v3611_v58 = vpop.f32.mrb[23].mxu0 }
 0x10d   :  { %4112 = vst [vmem:[#allocation13_spill] sm:$0xff] %v3611_v58  ;;  %v3613_v59 = vpop.f32.mrb[22].mxu1 }
 0x10e   :  { %v3617_v61 = vpop.f32.mrb[23].mxu1 }
 0x10f   :  { %v3615_v60 = vpop.f32.mrb[24].mxu0 }
 0x110   :  { %4113 = vst [vmem:[#allocation14_spill] sm:$0xff] %v3615_v60  ;;  %v3619_v62 = vpop.f32.mrb[25].mxu0  ;;  %v1427_v60 = vmax.f32 %v1229_v9, 0.0  ;;  %v1249_v9 = vadd.f32 %v3632_v3, %v3545_v25 }
 0x111   :  { %4114 = vst [vmem:[#allocation15_spill] sm:$0xff] %v3619_v62  ;;  %v3621_v63 = vpop.f32.mrb[24].mxu1 }
 0x112   :  { %v3625_v1 = vpop.f32.mrb[25].mxu1 }
 0x113   :  { %v3623_v0 = vpop.f32.mrb[26].mxu0 }
 0x114   :  { %4115 = vst [vmem:[#allocation16_spill] sm:$0xff] %v3623_v0  ;;  %v3627_v2 = vpop.f32.mrb[27].mxu0  ;;  %v1428_v0 = vmax.f32 %v1234_v8, 0.0 }
 0x115   :  { %4116 = vst [vmem:[#allocation17_spill] sm:$0xff] %v3627_v2  ;;  %v3634_v4 = vpop.f32.mrb[26].mxu1 }
 0x116   :  { %v3638_v6 = vpop.f32.mrb[27].mxu1 }
 0x117   :  { %v3636_v5 = vpop.f32.mrb[28].mxu0 }
 0x118   :  { %4117 = vst [vmem:[#allocation18_spill] sm:$0xff] %v3636_v5  ;;  %v3640_v7 = vpop.f32.mrb[29].mxu0 }
 0x119   :  { %4118 = vst [vmem:[#allocation19_spill] sm:$0xff] %v3640_v7  ;;  %v3644_v10 = vpop.f32.mrb[28].mxu1  ;;  %v1244_v7 = vadd.f32 %v2745_v19, %v3632_v3  ;;  %v1254_v19 = vadd.f32 %v3541_v23, %v3632_v3 }
 0x11a   :  { %v3651_v2 = vpop.f32.mrb[29].mxu1 }
 0x11b   :  { %v2644_v12 = vpop.f32.mrb[30].mxu0  ;;  %v1432_v23 = vmax.f32 %v1254_v19, 0.0 }
 0x11c   :  { %v520_v5 = vadd.f32 %v2644_v12, %v3649_v11  ;;  %v514_v62 = vpop.f32.mrb[31].mxu0  ;;  %v1430_v12 = vmax.f32 %v1244_v7, 0.0 }
 0x11d   :  { %v515_v15 = vadd.f32 %v3649_v11, %v514_v62  ;;  %v3658_v56 = vpop.f32.mrb[30].mxu1 }
 0x11e   :  { %v714_v58 = vmax.f32 %v520_v5, 0.0  ;;  %v3660_v50 = vpop.f32.mrb[31].mxu1  ;;  %v1429_v5 = vmax.f32 %v1239_v17, 0.0  ;;  %v1431_v17 = vmax.f32 %v1249_v9, 0.0 }
 0x11f   :  { %v713_v54 = vmax.f32 %v515_v15, 0.0  ;;  %v2647_v52 = vpop.f32.mrb[32].mxu0 }
 0x120   :  { %v3662_v48 = vadd.f32 %v1428_v0, %v714_v58  ;;  %v530_v8 = vadd.f32 %v2647_v52, %v3649_v11  ;;  %v524_v46 = vpop.f32.mrb[33].mxu0 }
 0x121   :  { %v3667_v62 = vadd.f32 %v1427_v60, %v713_v54  ;;  %v525_v21 = vadd.f32 %v3649_v11, %v524_v46  ;;  %v3672_v44 = vpop.f32.mrb[32].mxu1  ;;  %v1264_v46 = vadd.f32 %v3549_v27, %v3632_v3  ;;  %v1274_v27 = vadd.f32 %v3557_v31, %v3632_v3 }
 0x122   :  { %4119 = vst [vmem:[#allocation20_spill] sm:$0xff] %v3662_v48  ;;  %v716_v15 = vmax.f32 %v530_v8, 0.0  ;;  %v3674_v48 = vpop.f32.mrb[33].mxu1  ;;  %v1259_v8 = vadd.f32 %v3632_v3, %v3553_v29  ;;  %v1269_v29 = vadd.f32 %v3632_v3, %v3561_v33  ;;  %v1284_v31 = vadd.f32 %v3565_v35, %v3632_v3 }
 0x123   :  { %4120 = vst [vmem:[#allocation21_spill] sm:$0xff] %v3667_v62  ;;  %v715_v58 = vmax.f32 %v525_v21, 0.0  ;;  %v2650_v0 = vpop.f32.mrb[34].mxu0  ;;  %v1434_v19 = vmax.f32 %v1264_v46, 0.0  ;;  %v1436_v46 = vmax.f32 %v1274_v27, 0.0  ;;  %v1279_v33 = vadd.f32 %v3632_v3, %v3569_v37 }
 0x124   :  { %v3676_v52 = vadd.f32 %v1430_v12, %v716_v15  ;;  %v540_v7 = vadd.f32 %v2650_v0, %v3649_v11  ;;  %v534_v54 = vpop.f32.mrb[35].mxu0  ;;  %v1433_v9 = vmax.f32 %v1259_v8, 0.0  ;;  %v1435_v8 = vmax.f32 %v1269_v29, 0.0 }
 0x125   :  { %v3681_v60 = vadd.f32 %v1429_v5, %v715_v58  ;;  %v535_v25 = vadd.f32 %v3649_v11, %v534_v54  ;;  %v1438_v27 = vmax.f32 %v1284_v31, 0.0  ;;  %v1294_v35 = vadd.f32 %v3573_v39, %v3632_v3 }
 0x126   :  { %v718_v21 = vmax.f32 %v540_v7, 0.0  ;;  %v1437_v29 = vmax.f32 %v1279_v33, 0.0  ;;  %v1289_v37 = vadd.f32 %v3632_v3, %v3577_v41  ;;  %v1304_v39 = vadd.f32 %v3581_v43, %v3632_v3 }
 0x127   :  { %v717_v62 = vmax.f32 %v535_v25, 0.0  ;;  %v2653_v42 = vpop.f32.mrb[36].mxu0  ;;  %v1440_v31 = vmax.f32 %v1294_v35, 0.0  ;;  %v1299_v41 = vadd.f32 %v3632_v3, %v3585_v45  ;;  %v1314_v43 = vadd.f32 %v3589_v47, %v3632_v3 }
 0x128   :  { %v3686_v12 = vadd.f32 %v1432_v23, %v718_v21  ;;  %v550_v15 = vadd.f32 %v2653_v42, %v3649_v11  ;;  %v544_v0 = vpop.f32.mrb[37].mxu0  ;;  %v1439_v33 = vmax.f32 %v1289_v37, 0.0  ;;  %v1442_v35 = vmax.f32 %v1304_v39, 0.0 }
 0x129   :  { %v3691_v5 = vadd.f32 %v1431_v17, %v717_v62  ;;  %v545_v58 = vadd.f32 %v3649_v11, %v544_v0  ;;  %v1441_v37 = vmax.f32 %v1299_v41, 0.0  ;;  %v1309_v45 = vadd.f32 %v3632_v3, %v3593_v49 }
 0x12a   :  { %v720_v7 = vmax.f32 %v550_v15, 0.0  ;;  %v1444_v39 = vmax.f32 %v1314_v43, 0.0  ;;  %v1324_v47 = vadd.f32 %v3597_v51, %v3632_v3  ;;  %v1319_v49 = vadd.f32 %v3632_v3, %v3601_v53 }
 0x12b   :  { %v719_v54 = vmax.f32 %v545_v58, 0.0  ;;  %v2656_v25 = vpop.f32.mrb[38].mxu0  ;;  %v1443_v41 = vmax.f32 %v1309_v45, 0.0  ;;  %v1334_v51 = vadd.f32 %v3605_v55, %v3632_v3  ;;  %v1329_v53 = vadd.f32 %v3632_v3, %v3609_v57 }
 0x12c   :  { %v3696_v23 = vadd.f32 %v1434_v19, %v720_v7  ;;  %v560_v42 = vadd.f32 %v2656_v25, %v3649_v11  ;;  %v554_v21 = vpop.f32.mrb[39].mxu0  ;;  %v1446_v43 = vmax.f32 %v1324_v47, 0.0  ;;  %v1445_v45 = vmax.f32 %v1319_v49, 0.0 }
 0x12d   :  { %v3701_v62 = vadd.f32 %v1433_v9, %v719_v54  ;;  %v555_v17 = vadd.f32 %v3649_v11, %v554_v21  ;;  %v1448_v47 = vmax.f32 %v1334_v51, 0.0  ;;  %v1344_v55 = vadd.f32 %v3613_v59, %v3632_v3 }
 0x12e   :  { %v722_v15 = vmax.f32 %v560_v42, 0.0  ;;  %v1447_v49 = vmax.f32 %v1329_v53, 0.0  ;;  %v1339_v57 = vadd.f32 %v3632_v3, %v3617_v61  ;;  %v1354_v59 = vadd.f32 %v3621_v63, %v3632_v3 }
 0x12f   :  { %v721_v0 = vmax.f32 %v555_v17, 0.0  ;;  %v2659_v58 = vpop.f32.mrb[40].mxu0  ;;  %v1450_v51 = vmax.f32 %v1344_v55, 0.0  ;;  %v1349_v61 = vadd.f32 %v3632_v3, %v3625_v1  ;;  %v1364_v63 = vadd.f32 %v3634_v4, %v3632_v3 }
 0x130   :  { %v3706_v19 = vadd.f32 %v1436_v46, %v722_v15  ;;  %v570_v7 = vadd.f32 %v2659_v58, %v3649_v11  ;;  %v564_v25 = vpop.f32.mrb[41].mxu0  ;;  %v1449_v53 = vmax.f32 %v1339_v57, 0.0  ;;  %v1452_v55 = vmax.f32 %v1354_v59, 0.0 }
 0x131   :  { %v3711_v9 = vadd.f32 %v1435_v8, %v721_v0  ;;  %v565_v54 = vadd.f32 %v3649_v11, %v564_v25  ;;  %v1451_v57 = vmax.f32 %v1349_v61, 0.0  ;;  %v1359_v1 = vadd.f32 %v3632_v3, %v3638_v6 }
 0x132   :  { %v724_v42 = vmax.f32 %v570_v7, 0.0  ;;  %v1454_v59 = vmax.f32 %v1364_v63, 0.0  ;;  %v1374_v4 = vadd.f32 %v3644_v10, %v3632_v3  ;;  %v1369_v6 = vadd.f32 %v3632_v3, %v3651_v2 }
 0x133   :  { %v723_v21 = vmax.f32 %v565_v54, 0.0  ;;  %v2662_v17 = vpop.f32.mrb[42].mxu0  ;;  %v1453_v61 = vmax.f32 %v1359_v1, 0.0  ;;  %v1384_v10 = vadd.f32 %v3658_v56, %v3632_v3  ;;  %v1379_v2 = vadd.f32 %v3632_v3, %v3660_v50 }
 0x134   :  { %v3716_v46 = vadd.f32 %v1438_v27, %v724_v42  ;;  %v580_v15 = vadd.f32 %v2662_v17, %v3649_v11  ;;  %v574_v58 = vpop.f32.mrb[43].mxu0  ;;  %v1456_v63 = vmax.f32 %v1374_v4, 0.0  ;;  %v1455_v1 = vmax.f32 %v1369_v6, 0.0 }
 0x135   :  { %v3721_v8 = vadd.f32 %v1437_v29, %v723_v21  ;;  %v575_v0 = vadd.f32 %v3649_v11, %v574_v58  ;;  %v1458_v4 = vmax.f32 %v1384_v10, 0.0  ;;  %v1394_v56 = vadd.f32 %v3672_v44, %v3632_v3 }
 0x136   :  { %v726_v7 = vmax.f32 %v580_v15, 0.0  ;;  %v1457_v6 = vmax.f32 %v1379_v2, 0.0  ;;  %v1389_v50 = vadd.f32 %v3632_v3, %v3674_v48  ;;  %v370_v2 = vadd.f32 %v3527_v13, %v3649_v11 }
 0x137   :  { %v725_v25 = vmax.f32 %v575_v0, 0.0  ;;  %v2665_v54 = vpop.f32.mrb[44].mxu0  ;;  %v1460_v10 = vmax.f32 %v1394_v56, 0.0  ;;  %v365_v48 = vadd.f32 %v3649_v11, %v3529_v14  ;;  %v375_v14 = vadd.f32 %v3649_v11, %v3533_v18 }
 0x138   :  { %v3726_v27 = vadd.f32 %v1440_v31, %v726_v7  ;;  %v590_v42 = vadd.f32 %v2665_v54, %v3649_v11  ;;  %v584_v17 = vpop.f32.mrb[45].mxu0 }
 0x139   :  { %v3731_v29 = vadd.f32 %v1439_v33, %v725_v25  ;;  %v585_v21 = vadd.f32 %v3649_v11, %v584_v17 }
 0x13a   :  { %v728_v15 = vmax.f32 %v590_v42, 0.0 }
 0x13b   :  { %v727_v58 = vmax.f32 %v585_v21, 0.0  ;;  %v2668_v0 = vpop.f32.mrb[46].mxu0 }
 0x13c   :  { %v3736_v31 = vadd.f32 %v1442_v35, %v728_v15  ;;  %v600_v7 = vadd.f32 %v2668_v0, %v3649_v11  ;;  %v594_v54 = vpop.f32.mrb[47].mxu0 }
 0x13d   :  { %v3741_v33 = vadd.f32 %v1441_v37, %v727_v58  ;;  %v595_v25 = vadd.f32 %v3649_v11, %v594_v54 }
 0x13e   :  { %v730_v42 = vmax.f32 %v600_v7, 0.0 }
 0x13f   :  { %v729_v17 = vmax.f32 %v595_v25, 0.0  ;;  %v2671_v21 = vpop.f32.mrb[48].mxu0 }
 0x140   :  { %v3746_v35 = vadd.f32 %v1444_v39, %v730_v42  ;;  %v610_v15 = vadd.f32 %v2671_v21, %v3649_v11  ;;  %v604_v0 = vpop.f32.mrb[49].mxu0 }
 0x141   :  { %v3751_v37 = vadd.f32 %v1443_v41, %v729_v17  ;;  %v605_v58 = vadd.f32 %v3649_v11, %v604_v0 }
 0x142   :  { %v732_v7 = vmax.f32 %v610_v15, 0.0 }
 0x143   :  { %v731_v54 = vmax.f32 %v605_v58, 0.0  ;;  %v2674_v25 = vpop.f32.mrb[50].mxu0 }
 0x144   :  { %v3756_v39 = vadd.f32 %v1446_v43, %v732_v7  ;;  %v620_v42 = vadd.f32 %v2674_v25, %v3649_v11  ;;  %v614_v21 = vpop.f32.mrb[51].mxu0 }
 0x145   :  { %v3761_v41 = vadd.f32 %v1445_v45, %v731_v54  ;;  %v615_v17 = vadd.f32 %v3649_v11, %v614_v21 }
 0x146   :  { %v734_v15 = vmax.f32 %v620_v42, 0.0 }
 0x147   :  { %v733_v0 = vmax.f32 %v615_v17, 0.0  ;;  %v2677_v58 = vpop.f32.mrb[52].mxu0 }
 0x148   :  { %v3766_v43 = vadd.f32 %v1448_v47, %v734_v15  ;;  %v630_v7 = vadd.f32 %v2677_v58, %v3649_v11  ;;  %v624_v25 = vpop.f32.mrb[53].mxu0 }
 0x149   :  { %v3771_v45 = vadd.f32 %v1447_v49, %v733_v0  ;;  %v625_v54 = vadd.f32 %v3649_v11, %v624_v25 }
 0x14a   :  { %v736_v42 = vmax.f32 %v630_v7, 0.0 }
 0x14b   :  { %v735_v21 = vmax.f32 %v625_v54, 0.0  ;;  %v2680_v17 = vpop.f32.mrb[54].mxu0 }
 0x14c   :  { %v3776_v47 = vadd.f32 %v1450_v51, %v736_v42  ;;  %v640_v15 = vadd.f32 %v2680_v17, %v3649_v11  ;;  %v634_v58 = vpop.f32.mrb[55].mxu0 }
 0x14d   :  { %v3781_v49 = vadd.f32 %v1449_v53, %v735_v21  ;;  %v635_v0 = vadd.f32 %v3649_v11, %v634_v58 }
 0x14e   :  { %v738_v7 = vmax.f32 %v640_v15, 0.0 }
 0x14f   :  { %v737_v25 = vmax.f32 %v635_v0, 0.0  ;;  %v2683_v54 = vpop.f32.mrb[56].mxu0 }
 0x150   :  { %v3786_v51 = vadd.f32 %v1452_v55, %v738_v7  ;;  %v650_v42 = vadd.f32 %v2683_v54, %v3649_v11  ;;  %v644_v17 = vpop.f32.mrb[57].mxu0 }
 0x151   :  { %v3791_v53 = vadd.f32 %v1451_v57, %v737_v25  ;;  %v645_v21 = vadd.f32 %v3649_v11, %v644_v17 }
 0x152   :  { %v740_v15 = vmax.f32 %v650_v42, 0.0 }
 0x153   :  { %v739_v58 = vmax.f32 %v645_v21, 0.0  ;;  %v2686_v0 = vpop.f32.mrb[58].mxu0 }
 0x154   :  { %v3796_v55 = vadd.f32 %v1454_v59, %v740_v15  ;;  %v660_v7 = vadd.f32 %v2686_v0, %v3649_v11  ;;  %v654_v54 = vpop.f32.mrb[59].mxu0 }
 0x155   :  { %v3801_v57 = vadd.f32 %v1453_v61, %v739_v58  ;;  %v655_v25 = vadd.f32 %v3649_v11, %v654_v54 }
 0x156   :  { %v742_v42 = vmax.f32 %v660_v7, 0.0 }
 0x157   :  { %v741_v17 = vmax.f32 %v655_v25, 0.0  ;;  %v2689_v21 = vpop.f32.mrb[60].mxu0 }
 0x158   :  { %v3806_v59 = vadd.f32 %v1456_v63, %v742_v42  ;;  %v670_v15 = vadd.f32 %v2689_v21, %v3649_v11  ;;  %v664_v0 = vpop.f32.mrb[61].mxu0 }
 0x159   :  { %v3811_v61 = vadd.f32 %v1455_v1, %v741_v17  ;;  %v665_v58 = vadd.f32 %v3649_v11, %v664_v0  ;;  %v1459_v1 = vmax.f32 %v1389_v50, 0.0  ;;  %v380_v50 = vadd.f32 %v3531_v16, %v3649_v11 }
 0x15a   :  { %4121 = vst [vmem:[#allocation22_spill] sm:$0xff] %v3806_v59  ;;  %v744_v7 = vmax.f32 %v670_v15, 0.0  ;;  %v685_v16 = vmax.f32 %v375_v14, 0.0 }
 0x15b   :  { %v743_v54 = vmax.f32 %v665_v58, 0.0  ;;  %v2692_v25 = vpop.f32.mrb[62].mxu0 }
 0x15c   :  { %v3816_v63 = vadd.f32 %v1458_v4, %v744_v7  ;;  %v680_v42 = vadd.f32 %v2692_v25, %v3649_v11  ;;  %v674_v21 = vpop.f32.mrb[63].mxu0  ;;  %v683_v25 = vmax.f32 %v365_v48, 0.0  ;;  %v385_v48 = vadd.f32 %v3649_v11, %v3539_v22 }
 0x15d   :  { %v3819_v59 = vadd.f32 %v1457_v6, %v743_v54  ;;  %v675_v44 = vadd.f32 %v3649_v11, %v674_v21  ;;  %v684_v54 = vmax.f32 %v370_v2, 0.0  ;;  %v390_v2 = vadd.f32 %v3535_v20, %v3649_v11 }
 0x15e   :  { %v746_v17 = vmax.f32 %v680_v42, 0.0  ;;  %v400_v20 = vadd.f32 %v3543_v24, %v3649_v11  ;;  %v395_v22 = vadd.f32 %v3649_v11, %v3547_v26  ;;  %v410_v24 = vadd.f32 %v3551_v28, %v3649_v11 }
 0x15f   :  { %v745_v15 = vmax.f32 %v675_v44, 0.0  ;;  %v2697_v0 = vpop.f32.mrb[64].mxu0  ;;  %v405_v26 = vadd.f32 %v3649_v11, %v3555_v30  ;;  %v420_v28 = vadd.f32 %v3559_v32, %v3649_v11  ;;  %v415_v30 = vadd.f32 %v3649_v11, %v3563_v34 }
 0x160   :  { %v3826_v4 = vadd.f32 %v1460_v10, %v746_v17  ;;  %v1084_v58 = vadd.f32 %v2697_v0, %v3632_v3  ;;  %v1078_v56 = vpop.f32.mrb[65].mxu0  ;;  %v430_v32 = vadd.f32 %v3567_v36, %v3649_v11  ;;  %v425_v34 = vadd.f32 %v3649_v11, %v3571_v38  ;;  %v4122_v38 = vld [vmem:[#allocation5_spill] sm:$0xff] }
 0x161   :  { %v3829_v7 = vadd.f32 %v1459_v1, %v745_v15  ;;  %v1079_v6 = vadd.f32 %v3632_v3, %v1078_v56  ;;  %v686_v15 = vmax.f32 %v380_v50, 0.0  ;;  %v440_v36 = vadd.f32 %v3575_v40, %v3649_v11  ;;  %v4123_v40 = vld [vmem:[#allocation6_spill] sm:$0xff] }
 0x162   :  { %v1398_v13 = vmax.f32 %v1084_v58, 0.0 }
 0x163   :  { %v1397_v42 = vmax.f32 %v1079_v6, 0.0  ;;  %v2700_v21 = vpop.f32.mrb[66].mxu0 }
 0x164   :  { %v1462_v10 = vadd.f32 %v1398_v13, %v684_v54  ;;  %v1094_v44 = vadd.f32 %v2700_v21, %v3632_v3  ;;  %v1088_v17 = vpop.f32.mrb[67].mxu0  ;;  %v687_v21 = vmax.f32 %v385_v48, 0.0  ;;  %v689_v48 = vmax.f32 %v395_v22, 0.0 }
 0x165   :  { %v1461_v0 = vadd.f32 %v1397_v42, %v683_v25  ;;  %v1089_v1 = vadd.f32 %v3632_v3, %v1088_v17  ;;  %v688_v42 = vmax.f32 %v390_v2, 0.0 }
 0x166   :  { %v1400_v56 = vmax.f32 %v1094_v44, 0.0 }
 0x167   :  { %v1399_v58 = vmax.f32 %v1089_v1, 0.0  ;;  %v2703_v18 = vpop.f32.mrb[68].mxu0  ;;  %2799 = vmatprep.mubr.msk.f32.mxu1 %vm105_vm0, %v1461_v0 }
 0x168   :  { %v1464_v6 = vadd.f32 %v1400_v56, %v686_v15  ;;  %v1104_v54 = vadd.f32 %v2703_v18, %v3632_v3  ;;  %v1098_v13 = vpop.f32.mrb[69].mxu0  ;;  %2800 = vmatmul.mubr.msk.f32.vlgmr.msra.gmra.mrb[34].mxu1 %vm105_vm0, %v1462_v10  ;;  %v690_v56 = vmax.f32 %v400_v20, 0.0 }
 0x169   :  { %v1463_v25 = vadd.f32 %v1399_v58, %v685_v16  ;;  %v1099_v50 = vadd.f32 %v3632_v3, %v1098_v13 }
 0x16a   :  { %v1402_v14 = vmax.f32 %v1104_v54, 0.0 }
 0x16b   :  { %v1401_v44 = vmax.f32 %v1099_v50, 0.0  ;;  %v2706_v17 = vpop.f32.mrb[70].mxu0  ;;  %2802 = vmatprep.mubr.msk.f32.mxu1 %vm105_vm0, %v1463_v25 }
 0x16c   :  { %v1466_v0 = vadd.f32 %v1402_v14, %v688_v42  ;;  %v1114_v1 = vadd.f32 %v2706_v17, %v3632_v3  ;;  %v1108_v10 = vpop.f32.mrb[71].mxu0  ;;  %2803 = vmatmul.mubr.msk.f32.gmra.mrb[36].mxu1 %vm105_vm0, %v1464_v6  ;;  %v692_v42 = vmax.f32 %v410_v24, 0.0  ;;  %v691_v14 = vmax.f32 %v405_v26, 0.0 }
 0x16d   :  { %v1465_v15 = vadd.f32 %v1401_v44, %v687_v21  ;;  %v1109_v2 = vadd.f32 %v3632_v3, %v1108_v10 }
 0x16e   :  { %v1404_v16 = vmax.f32 %v1114_v1, 0.0 }
 0x16f   :  { %v1403_v58 = vmax.f32 %v1109_v2, 0.0  ;;  %v2709_v18 = vpop.f32.mrb[72].mxu0  ;;  %2805 = vmatprep.mubr.msk.f32.mxu1 %vm105_vm0, %v1465_v15  ;;  %v694_v15 = vmax.f32 %v420_v28, 0.0 }
 0x170   :  { %v1468_v54 = vadd.f32 %v1404_v16, %v690_v56  ;;  %v1124_v13 = vadd.f32 %v2709_v18, %v3632_v3  ;;  %v1118_v6 = vpop.f32.mrb[73].mxu0  ;;  %2806 = vmatmul.mubr.msk.f32.gmra.mrb[38].mxu1 %vm105_vm0, %v1466_v0  ;;  %v693_v56 = vmax.f32 %v415_v30, 0.0 }
 0x171   :  { %v1467_v25 = vadd.f32 %v1403_v58, %v689_v48  ;;  %v1119_v50 = vadd.f32 %v3632_v3, %v1118_v6 }
 0x172   :  { %v1406_v20 = vmax.f32 %v1124_v13, 0.0  ;;  %v696_v13 = vmax.f32 %v430_v32, 0.0 }
 0x173   :  { %v1405_v21 = vmax.f32 %v1119_v50, 0.0  ;;  %v2712_v22 = vpop.f32.mrb[74].mxu0  ;;  %2808 = vmatprep.mubr.msk.f32.mxu1 %vm105_vm0, %v1467_v25  ;;  %v695_v25 = vmax.f32 %v425_v34, 0.0  ;;  %v435_v50 = vadd.f32 %v3649_v11, %v4122_v38 }
 0x174   :  { %v1470_v44 = vadd.f32 %v1406_v20, %v692_v42  ;;  %v1134_v17 = vadd.f32 %v2712_v22, %v3632_v3  ;;  %v1128_v0 = vpop.f32.mrb[75].mxu0  ;;  %2809 = vmatmul.mubr.msk.f32.gmra.mrb[40].mxu1 %vm105_vm0, %v1468_v54 }
 0x175   :  { %v1469_v1 = vadd.f32 %v1405_v21, %v691_v14  ;;  %v1129_v10 = vadd.f32 %v3632_v3, %v1128_v0 }
 0x176   :  { %v1408_v2 = vmax.f32 %v1134_v17, 0.0  ;;  %v450_v17 = vadd.f32 %v4123_v40, %v3649_v11 }
 0x177   :  { %v1407_v24 = vmax.f32 %v1129_v10, 0.0  ;;  %v2715_v16 = vpop.f32.mrb[76].mxu0  ;;  %2811 = vmatprep.mubr.msk.f32.mxu1 %vm105_vm0, %v1469_v1  ;;  %v697_v1 = vmax.f32 %v435_v50, 0.0  ;;  %v4124_v10 = vld [vmem:[#allocation7_spill] sm:$0xff] }
 0x178   :  { %v1472_v48 = vadd.f32 %v1408_v2, %v694_v15  ;;  %v1144_v26 = vadd.f32 %v2715_v16, %v3632_v3  ;;  %v1138_v58 = vpop.f32.mrb[77].mxu0  ;;  %2812 = vmatmul.mubr.msk.f32.gmra.mrb[42].mxu1 %vm105_vm0, %v1470_v44  ;;  %v698_v44 = vmax.f32 %v440_v36, 0.0  ;;  %v445_v15 = vadd.f32 %v3649_v11, %v4124_v10  ;;  %v4126_v36 = vld [vmem:[#allocation9_spill] sm:$0xff] }
 0x179   :  { %v1471_v18 = vadd.f32 %v1407_v24, %v693_v56  ;;  %v1139_v54 = vadd.f32 %v3632_v3, %v1138_v58  ;;  %v4125_v58 = vld [vmem:[#allocation8_spill] sm:$0xff] }
 0x17a   :  { %v1410_v6 = vmax.f32 %v1144_v26, 0.0  ;;  %v700_v26 = vmax.f32 %v450_v17, 0.0  ;;  %v4128_v17 = vld [vmem:[#allocation11_spill] sm:$0xff] }
 0x17b   :  { %v1409_v42 = vmax.f32 %v1139_v54, 0.0  ;;  %v2718_v28 = vpop.f32.mrb[78].mxu0  ;;  %2814 = vmatprep.mubr.msk.f32.mxu1 %vm105_vm0, %v1471_v18  ;;  %v460_v18 = vadd.f32 %v4125_v58, %v3649_v11 }
 0x17c   :  { %v1474_v20 = vadd.f32 %v1410_v6, %v696_v13  ;;  %v1154_v14 = vadd.f32 %v2718_v28, %v3632_v3  ;;  %v1148_v30 = vpop.f32.mrb[79].mxu0  ;;  %2815 = vmatmul.mubr.msk.f32.gmra.mrb[44].mxu1 %vm105_vm0, %v1472_v48  ;;  %v699_v13 = vmax.f32 %v445_v15, 0.0  ;;  %v455_v6 = vadd.f32 %v3649_v11, %v4126_v36 }
 0x17d   :  { %v1473_v21 = vadd.f32 %v1409_v42, %v695_v25  ;;  %v1149_v22 = vadd.f32 %v3632_v3, %v1148_v30  ;;  %v702_v30 = vmax.f32 %v460_v18, 0.0  ;;  %v4130_v18 = vld [vmem:[#allocation13_spill] sm:$0xff] }
 0x17e   :  { %v1412_v0 = vmax.f32 %v1154_v14, 0.0  ;;  %v701_v40 = vmax.f32 %v455_v6, 0.0 }
 0x17f   :  { %v1411_v32 = vmax.f32 %v1149_v22, 0.0  ;;  %v2721_v2 = vpop.f32.mrb[80].mxu0  ;;  %2817 = vmatprep.mubr.msk.f32.mxu1 %vm105_vm0, %v1473_v21  ;;  %v4127_v21 = vld [vmem:[#allocation10_spill] sm:$0xff] }
 0x180   :  { %v1476_v56 = vadd.f32 %v1412_v0, %v698_v44  ;;  %v1164_v34 = vadd.f32 %v2721_v2, %v3632_v3  ;;  %v1158_v24 = vpop.f32.mrb[81].mxu0  ;;  %2818 = vmatmul.mubr.msk.f32.gmra.mrb[46].mxu1 %vm105_vm0, %v1474_v20  ;;  %v470_v22 = vadd.f32 %v4127_v21, %v3649_v11  ;;  %v465_v0 = vadd.f32 %v3649_v11, %v4128_v17 }
 0x181   :  { %v1475_v16 = vadd.f32 %v1411_v32, %v697_v1  ;;  %v1159_v48 = vadd.f32 %v3632_v3, %v1158_v24 }
 0x182   :  { %v1414_v54 = vmax.f32 %v1164_v34, 0.0  ;;  %v704_v24 = vmax.f32 %v470_v22, 0.0  ;;  %v703_v58 = vmax.f32 %v465_v0, 0.0  ;;  %v4132_v22 = vld [vmem:[#allocation15_spill] sm:$0xff] }
 0x183   :  { %v1413_v25 = vmax.f32 %v1159_v48, 0.0  ;;  %v2724_v38 = vpop.f32.mrb[82].mxu0  ;;  %2820 = vmatprep.mubr.msk.f32.mxu1 %vm105_vm0, %v1475_v16  ;;  %v4129_v16 = vld [vmem:[#allocation12_spill] sm:$0xff] }
 0x184   :  { %v1478_v50 = vadd.f32 %v1414_v54, %v700_v26  ;;  %v1174_v42 = vadd.f32 %v2724_v38, %v3632_v3  ;;  %v1168_v28 = vpop.f32.mrb[83].mxu0  ;;  %2821 = vmatmul.mubr.msk.f32.gmra.mrb[48].mxu1 %vm105_vm0, %v1476_v56  ;;  %v480_v48 = vadd.f32 %v4129_v16, %v3649_v11  ;;  %v475_v54 = vadd.f32 %v3649_v11, %v4130_v18 }
 0x185   :  { %v1477_v20 = vadd.f32 %v1413_v25, %v699_v13  ;;  %v1169_v14 = vadd.f32 %v3632_v3, %v1168_v28 }
 0x186   :  { %v1416_v44 = vmax.f32 %v1174_v42, 0.0  ;;  %v706_v28 = vmax.f32 %v480_v48, 0.0  ;;  %v705_v21 = vmax.f32 %v475_v54, 0.0  ;;  %v4134_v48 = vld [vmem:[#allocation17_spill] sm:$0xff] }
 0x187   :  { %v1415_v1 = vmax.f32 %v1169_v14, 0.0  ;;  %v2727_v10 = vpop.f32.mrb[84].mxu0  ;;  %2823 = vmatprep.mubr.msk.f32.mxu1 %vm105_vm0, %v1477_v20  ;;  %v4131_v20 = vld [vmem:[#allocation14_spill] sm:$0xff] }
 0x188   :  { %v1480_v15 = vadd.f32 %v1416_v44, %v702_v30  ;;  %v1184_v32 = vadd.f32 %v2727_v10, %v3632_v3  ;;  %v1178_v2 = vpop.f32.mrb[85].mxu0  ;;  %2824 = vmatmul.mubr.msk.f32.gmra.mrb[50].mxu1 %vm105_vm0, %v1478_v50  ;;  %v490_v14 = vadd.f32 %v4131_v20, %v3649_v11  ;;  %v485_v44 = vadd.f32 %v3649_v11, %v4132_v22 }
 0x189   :  { %v1479_v56 = vadd.f32 %v1415_v1, %v701_v40  ;;  %v1179_v34 = vadd.f32 %v3632_v3, %v1178_v2 }
 0x18a   :  { %v1418_v26 = vmax.f32 %v1184_v32, 0.0  ;;  %v708_v2 = vmax.f32 %v490_v14, 0.0  ;;  %v707_v16 = vmax.f32 %v485_v44, 0.0  ;;  %v4136_v14 = vld [vmem:[#allocation19_spill] sm:$0xff] }
 0x18b   :  { %v1417_v13 = vmax.f32 %v1179_v34, 0.0  ;;  %v2730_v36 = vpop.f32.mrb[86].mxu0  ;;  %2826 = vmatprep.mubr.msk.f32.mxu1 %vm105_vm0, %v1479_v56  ;;  %v4133_v56 = vld [vmem:[#allocation16_spill] sm:$0xff] }
 0x18c   :  { %v1482_v6 = vadd.f32 %v1418_v26, %v704_v24  ;;  %v1194_v25 = vadd.f32 %v2730_v36, %v3632_v3  ;;  %v1188_v38 = vpop.f32.mrb[87].mxu0  ;;  %2827 = vmatmul.mubr.msk.f32.gmra.mrb[52].mxu1 %vm105_vm0, %v1480_v15  ;;  %v500_v34 = vadd.f32 %v4133_v56, %v3649_v11  ;;  %v495_v26 = vadd.f32 %v3649_v11, %v4134_v48 }
 0x18d   :  { %v1481_v50 = vadd.f32 %v1417_v13, %v703_v58  ;;  %v1189_v42 = vadd.f32 %v3632_v3, %v1188_v38 }
 0x18e   :  { %v1420_v30 = vmax.f32 %v1194_v25, 0.0  ;;  %v710_v38 = vmax.f32 %v500_v34, 0.0  ;;  %v709_v20 = vmax.f32 %v495_v26, 0.0  ;;  %v4137_v34 = vld [vmem:[#allocation21_spill] sm:$0xff] }
 0x18f   :  { %v1419_v40 = vmax.f32 %v1189_v42, 0.0  ;;  %v2733_v17 = vpop.f32.mrb[88].mxu0  ;;  %2829 = vmatprep.mubr.msk.f32.mxu1 %vm105_vm0, %v1481_v50  ;;  %v4135_v50 = vld [vmem:[#allocation18_spill] sm:$0xff] }
 0x190   :  { %v1484_v0 = vadd.f32 %v1420_v30, %v706_v28  ;;  %v1204_v1 = vadd.f32 %v2733_v17, %v3632_v3  ;;  %v1198_v10 = vpop.f32.mrb[89].mxu0  ;;  %2830 = vmatmul.mubr.msk.f32.gmra.mrb[54].mxu1 %vm105_vm0, %v1482_v6  ;;  %v510_v42 = vadd.f32 %v4135_v50, %v3649_v11  ;;  %v505_v30 = vadd.f32 %v3649_v11, %v4136_v14 }
 0x191   :  { %v1483_v15 = vadd.f32 %v1419_v40, %v705_v21  ;;  %v1199_v32 = vadd.f32 %v3632_v3, %v1198_v10 }
 0x192   :  { %v1422_v24 = vmax.f32 %v1204_v1, 0.0  ;;  %v712_v10 = vmax.f32 %v510_v42, 0.0 }
 0x193   :  { %v1421_v58 = vmax.f32 %v1199_v32, 0.0  ;;  %v2736_v18 = vpop.f32.mrb[90].mxu0  ;;  %2832 = vmatprep.mubr.msk.f32.mxu1 %vm105_vm0, %v1483_v15  ;;  %v711_v32 = vmax.f32 %v505_v30, 0.0 }
 0x194   :  { %v1486_v54 = vadd.f32 %v1422_v24, %v708_v2  ;;  %v1214_v13 = vadd.f32 %v2736_v18, %v3632_v3  ;;  %v1208_v36 = vpop.f32.mrb[91].mxu0  ;;  %2833 = vmatmul.mubr.msk.f32.gmra.mrb[56].mxu1 %vm105_vm0, %v1484_v0  ;;  %v4138_v24 = vld [vmem:[#allocation20_spill] sm:$0xff] }
 0x195   :  { %v1485_v6 = vadd.f32 %v1421_v58, %v707_v16  ;;  %v1209_v25 = vadd.f32 %v3632_v3, %v1208_v36 }
 0x196   :  { %v1424_v28 = vmax.f32 %v1214_v13, 0.0 }
 0x197   :  { %v1423_v21 = vmax.f32 %v1209_v25, 0.0  ;;  %v2739_v22 = vpop.f32.mrb[92].mxu0  ;;  %2835 = vmatprep.mubr.msk.f32.mxu1 %vm105_vm0, %v1485_v6 }
 0x198   :  { %v1488_v44 = vadd.f32 %v1424_v28, %v710_v38  ;;  %v1224_v40 = vadd.f32 %v2739_v22, %v3632_v3  ;;  %v1218_v17 = vpop.f32.mrb[93].mxu0  ;;  %2836 = vmatmul.mubr.msk.f32.gmra.mrb[58].mxu1 %vm105_vm0, %v1486_v54 }
 0x199   :  { %v1487_v0 = vadd.f32 %v1423_v21, %v709_v20  ;;  %v1219_v1 = vadd.f32 %v3632_v3, %v1218_v17  ;;  %v4139_v3 = vld [vmem:[#allocation22_spill] sm:$0xff] }
 0x19a   :  { %v1426_v15 = vmax.f32 %v1224_v40, 0.0 }
 0x19b   :  { %v1425_v2 = vmax.f32 %v1219_v1, 0.0  ;;  %2838 = vmatprep.mubr.msk.f32.mxu1 %vm105_vm0, %v1487_v0 }
 0x19c   :  { %v1490_v11 = vadd.f32 %v1426_v15, %v712_v10  ;;  %2839 = vmatmul.mubr.msk.f32.gmra.mrb[60].mxu1 %vm105_vm0, %v1488_v44 }
 0x19d   :  { %v1489_v56 = vadd.f32 %v1425_v2, %v711_v32 }
 0x19f   :  { %2841 = vmatprep.mubr.msk.f32.mxu1 %vm105_vm0, %v1489_v56 }
 0x1a0   :  { %2842 = vmatmul.mubr.msk.f32.gmra.mrb[62].mxu1 %vm105_vm0, %v1490_v11 }
 0x1a1   :  { %2844 = vmatprep.mubr.msk.f32.mxu1 %vm105_vm0, %v4137_v34 }
 0x1a4   :  { %2845 = vmatmul.mubr.msk.f32.gmra.mrb[64].mxu1 %vm105_vm0, %v4138_v24 }
 0x1a5   :  { %2847 = vmatprep.mubr.msk.f32.mxu1 %vm105_vm0, %v3681_v60 }
 0x1a8   :  { %2848 = vmatmul.mubr.msk.f32.gmra.mrb[66].mxu1 %vm105_vm0, %v3676_v52  ;;  %v4017_v52 = vld [vmem:[%s4102_s7] ss:$0 sm:$0xff]  ;;  %s2940_s7 = smov [#allocation2]  }
 0x1a9   :  { %2850 = vmatprep.mubr.msk.f32.mxu1 %vm105_vm0, %v3691_v5  ;;  %s2182_s14 = sshll.u32 %s2940_s7, 4  ;;  %s2183_s14 = int_to_ptr.vmem [resolvable:$true] %s2182_s14 }
 0x1aa   :  { %s2916_s15 = scalar_lea.vmem %s2183_s14, 8192  ;;  %p2921_p1 = scmp.lt.s32.totalorder %s2183_s14, %s2183_s14 }
 0x1ab   :  { %p2917_p0 = scmp.ne.s32.totalorder %s2183_s14, %s2916_s15  ;;  %p2922_p2 = scmp.lt.s32.totalorder %s2916_s15, %s2916_s15 }
 0x1ac   :  { %2851 = vmatmul.mubr.msk.f32.gmra.mrb[68].mxu1 %vm105_vm0, %v3686_v12 }
 0x1ad   :  { %2853 = vmatprep.mubr.msk.f32.mxu1 %vm105_vm0, %v3701_v62  ;;  %p2923_p3 = por %p2922_p2, %p2921_p1 }
 0x1af   :  { %p2924_p4 = pnand %p2923_p3, %p2917_p0 }
 0x1b0   :  { %2854 = vmatmul.mubr.msk.f32.gmra.mrb[70].mxu1 %vm105_vm0, %v3696_v23 }
 0x1b1   :  { %2856 = vmatprep.mubr.msk.f32.mxu1 %vm105_vm0, %v3711_v9 }
 0x1b4   :  { %2857 = vmatmul.mubr.msk.f32.gmra.mrb[72].mxu1 %vm105_vm0, %v3706_v19 }
 0x1b5   :  { %2859 = vmatprep.mubr.msk.f32.mxu1 %vm105_vm0, %v3721_v8 }
 0x1b8   :  { %2860 = vmatmul.mubr.msk.f32.gmra.mrb[74].mxu1 %vm105_vm0, %v3716_v46 }
 0x1b9   :  { %2862 = vmatprep.mubr.msk.f32.mxu1 %vm105_vm0, %v3731_v29 }
 0x1bc   :  { %2863 = vmatmul.mubr.msk.f32.gmra.mrb[76].mxu1 %vm105_vm0, %v3726_v27 }
 0x1bd   :  { %2865 = vmatprep.mubr.msk.f32.mxu1 %vm105_vm0, %v3741_v33 }
 0x1c0   :  { %2866 = vmatmul.mubr.msk.f32.gmra.mrb[78].mxu1 %vm105_vm0, %v3736_v31 }
 0x1c1   :  { %2868 = vmatprep.mubr.msk.f32.mxu1 %vm105_vm0, %v3751_v37 }
 0x1c4   :  { %2869 = vmatmul.mubr.msk.f32.gmra.mrb[80].mxu1 %vm105_vm0, %v3746_v35 }
 0x1c5   :  { %2871 = vmatprep.mubr.msk.f32.mxu1 %vm105_vm0, %v3761_v41 }
 0x1c8   :  { %2872 = vmatmul.mubr.msk.f32.gmra.mrb[82].mxu1 %vm105_vm0, %v3756_v39 }
 0x1c9   :  { %2874 = vmatprep.mubr.msk.f32.mxu1 %vm105_vm0, %v3771_v45 }
 0x1cc   :  { %2875 = vmatmul.mubr.msk.f32.gmra.mrb[84].mxu1 %vm105_vm0, %v3766_v43 }
 0x1cd   :  { %2877 = vmatprep.mubr.msk.f32.mxu1 %vm105_vm0, %v3781_v49 }
 0x1d0   :  { %2878 = vmatmul.mubr.msk.f32.gmra.mrb[86].mxu1 %vm105_vm0, %v3776_v47 }
 0x1d1   :  { %2880 = vmatprep.mubr.msk.f32.mxu1 %vm105_vm0, %v3791_v53 }
 0x1d4   :  { %2881 = vmatmul.mubr.msk.f32.gmra.mrb[88].mxu1 %vm105_vm0, %v3786_v51 }
 0x1d5   :  { %2883 = vmatprep.mubr.msk.f32.mxu1 %vm105_vm0, %v3801_v57 }
 0x1d8   :  { %2884 = vmatmul.mubr.msk.f32.gmra.mrb[90].mxu1 %vm105_vm0, %v3796_v55 }
 0x1d9   :  { %2886 = vmatprep.mubr.msk.f32.mxu1 %vm105_vm0, %v3811_v61 }
 0x1dc   :  { %2887 = vmatmul.mubr.msk.f32.gmra.mrb[92].mxu1 %vm105_vm0, %v4139_v3 }
 0x1dd   :  { %2889 = vmatprep.mubr.msk.f32.mxu1 %vm105_vm0, %v3819_v59 }
 0x1e0   :  { %2890 = vmatmul.mubr.msk.f32.gmra.mrb[94].mxu1 %vm105_vm0, %v3816_v63 }
 0x1e1   :  { %2892 = vmatprep.mubr.msk.f32.mxu1 %vm105_vm0, %v3829_v7 }
 0x1e4   :  { %2893 = vmatmul.mubr.msk.f32.gmra.mrb[96].mxu1 %vm105_vm0, %v3826_v4 }
 0x23b   :  { %v2801_v60 = vpop.f32.mrb[34].mxu1 }
 0x23c   :  { %v1800_v12 = vadd.f32 %v2801_v60, %v4017_v52  ;;  %v1794_v5 = vpop.f32.mrb[35].mxu1 }
 0x23d   :  { %v1795_v23 = vadd.f32 %v4017_v52, %v1794_v5 }
 0x23e   :  { %2114 = vst [vmem:[#allocation2 + $0x8] sm:$0xff] %v1800_v12 }
 0x23f   :  { %2113 = vst [vmem:[#allocation2] sm:$0xff] %v1795_v23  ;;  %v2804_v62 = vpop.f32.mrb[36].mxu1 }
 0x240   :  { %v1810_v19 = vadd.f32 %v2804_v62, %v4017_v52  ;;  %v1804_v9 = vpop.f32.mrb[37].mxu1 }
 0x241   :  { %v1805_v46 = vadd.f32 %v4017_v52, %v1804_v9 }
 0x242   :  { %2116 = vst [vmem:[#allocation2 + $0x18] sm:$0xff] %v1810_v19 }
 0x243   :  { %2115 = vst [vmem:[#allocation2 + $0x10] sm:$0xff] %v1805_v46  ;;  %v2807_v8 = vpop.f32.mrb[38].mxu1 }
 0x244   :  { %v1820_v27 = vadd.f32 %v2807_v8, %v4017_v52  ;;  %v1814_v29 = vpop.f32.mrb[39].mxu1 }
 0x245   :  { %v1815_v31 = vadd.f32 %v4017_v52, %v1814_v29 }
 0x246   :  { %2118 = vst [vmem:[#allocation2 + $0x28] sm:$0xff] %v1820_v27 }
 0x247   :  { %2117 = vst [vmem:[#allocation2 + $0x20] sm:$0xff] %v1815_v31  ;;  %v2810_v33 = vpop.f32.mrb[40].mxu1 }
 0x248   :  { %v1830_v35 = vadd.f32 %v2810_v33, %v4017_v52  ;;  %v1824_v37 = vpop.f32.mrb[41].mxu1 }
 0x249   :  { %v1825_v39 = vadd.f32 %v4017_v52, %v1824_v37 }
 0x24a   :  { %2120 = vst [vmem:[#allocation2 + $0x38] sm:$0xff] %v1830_v35 }
 0x24b   :  { %2119 = vst [vmem:[#allocation2 + $0x30] sm:$0xff] %v1825_v39  ;;  %v2813_v41 = vpop.f32.mrb[42].mxu1 }
 0x24c   :  { %v1840_v43 = vadd.f32 %v2813_v41, %v4017_v52  ;;  %v1834_v45 = vpop.f32.mrb[43].mxu1 }
 0x24d   :  { %v1835_v47 = vadd.f32 %v4017_v52, %v1834_v45 }
 0x24e   :  { %2122 = vst [vmem:[#allocation2 + $0x48] sm:$0xff] %v1840_v43 }
 0x24f   :  { %2121 = vst [vmem:[#allocation2 + $0x40] sm:$0xff] %v1835_v47  ;;  %v2816_v49 = vpop.f32.mrb[44].mxu1 }
 0x250   :  { %v1850_v51 = vadd.f32 %v2816_v49, %v4017_v52  ;;  %v1844_v53 = vpop.f32.mrb[45].mxu1 }
 0x251   :  { %v1845_v55 = vadd.f32 %v4017_v52, %v1844_v53 }
 0x252   :  { %2124 = vst [vmem:[#allocation2 + $0x58] sm:$0xff] %v1850_v51 }
 0x253   :  { %2123 = vst [vmem:[#allocation2 + $0x50] sm:$0xff] %v1845_v55  ;;  %v2819_v57 = vpop.f32.mrb[46].mxu1 }
 0x254   :  { %v1860_v59 = vadd.f32 %v2819_v57, %v4017_v52  ;;  %v1854_v61 = vpop.f32.mrb[47].mxu1 }
 0x255   :  { %v1855_v63 = vadd.f32 %v4017_v52, %v1854_v61 }
 0x256   :  { %2126 = vst [vmem:[#allocation2 + $0x68] sm:$0xff] %v1860_v59 }
 0x257   :  { %2125 = vst [vmem:[#allocation2 + $0x60] sm:$0xff] %v1855_v63  ;;  %v2822_v4 = vpop.f32.mrb[48].mxu1 }
 0x258   :  { %v1870_v7 = vadd.f32 %v2822_v4, %v4017_v52  ;;  %v1864_v16 = vpop.f32.mrb[49].mxu1 }
 0x259   :  { %v1865_v48 = vadd.f32 %v4017_v52, %v1864_v16 }
 0x25a   :  { %2128 = vst [vmem:[#allocation2 + $0x78] sm:$0xff] %v1870_v7 }
 0x25b   :  { %2127 = vst [vmem:[#allocation2 + $0x70] sm:$0xff] %v1865_v48  ;;  %v2825_v26 = vpop.f32.mrb[50].mxu1 }
 0x25c   :  { %v1880_v58 = vadd.f32 %v2825_v26, %v4017_v52  ;;  %v1874_v18 = vpop.f32.mrb[51].mxu1 }
 0x25d   :  { %v1875_v54 = vadd.f32 %v4017_v52, %v1874_v18 }
 0x25e   :  { %2130 = vst [vmem:[#allocation2 + $0x88] sm:$0xff] %v1880_v58 }
 0x25f   :  { %2129 = vst [vmem:[#allocation2 + $0x80] sm:$0xff] %v1875_v54  ;;  %v2828_v13 = vpop.f32.mrb[52].mxu1 }
 0x260   :  { %v1890_v36 = vadd.f32 %v2828_v13, %v4017_v52  ;;  %v1884_v6 = vpop.f32.mrb[53].mxu1 }
 0x261   :  { %v1885_v25 = vadd.f32 %v4017_v52, %v1884_v6 }
 0x262   :  { %2132 = vst [vmem:[#allocation2 + $0x98] sm:$0xff] %v1890_v36 }
 0x263   :  { %2131 = vst [vmem:[#allocation2 + $0x90] sm:$0xff] %v1885_v25  ;;  %v2831_v38 = vpop.f32.mrb[54].mxu1 }
 0x264   :  { %v1900_v50 = vadd.f32 %v2831_v38, %v4017_v52  ;;  %v1894_v42 = vpop.f32.mrb[55].mxu1 }
 0x265   :  { %v1895_v28 = vadd.f32 %v4017_v52, %v1894_v42 }
 0x266   :  { %2134 = vst [vmem:[#allocation2 + $0xa8] sm:$0xff] %v1900_v50 }
 0x267   :  { %2133 = vst [vmem:[#allocation2 + $0xa0] sm:$0xff] %v1895_v28  ;;  %v2834_v20 = vpop.f32.mrb[56].mxu1 }
 0x268   :  { %v1910_v14 = vadd.f32 %v2834_v20, %v4017_v52  ;;  %v1904_v30 = vpop.f32.mrb[57].mxu1 }
 0x269   :  { %v1905_v21 = vadd.f32 %v4017_v52, %v1904_v30 }
 0x26a   :  { %2136 = vst [vmem:[#allocation2 + $0xb8] sm:$0xff] %v1910_v14 }
 0x26b   :  { %2135 = vst [vmem:[#allocation2 + $0xb0] sm:$0xff] %v1905_v21  ;;  %v2837_v22 = vpop.f32.mrb[58].mxu1 }
 0x26c   :  { %v1920_v44 = vadd.f32 %v2837_v22, %v4017_v52  ;;  %v1914_v40 = vpop.f32.mrb[59].mxu1 }
 0x26d   :  { %v1915_v17 = vadd.f32 %v4017_v52, %v1914_v40 }
 0x26e   :  { %2138 = vst [vmem:[#allocation2 + $0xc8] sm:$0xff] %v1920_v44 }
 0x26f   :  { %2137 = vst [vmem:[#allocation2 + $0xc0] sm:$0xff] %v1915_v17  ;;  %v2840_v0 = vpop.f32.mrb[60].mxu1 }
 0x270   :  { %v1930_v1 = vadd.f32 %v2840_v0, %v4017_v52  ;;  %v1924_v10 = vpop.f32.mrb[61].mxu1 }
 0x271   :  { %v1925_v15 = vadd.f32 %v4017_v52, %v1924_v10 }
 0x272   :  { %2140 = vst [vmem:[#allocation2 + $0xd8] sm:$0xff] %v1930_v1 }
 0x273   :  { %2139 = vst [vmem:[#allocation2 + $0xd0] sm:$0xff] %v1925_v15  ;;  %v2843_v32 = vpop.f32.mrb[62].mxu1 }
 0x274   :  { %v1940_v2 = vadd.f32 %v2843_v32, %v4017_v52  ;;  %v1934_v11 = vpop.f32.mrb[63].mxu1 }
 0x275   :  { %v1935_v56 = vadd.f32 %v4017_v52, %v1934_v11 }
 0x276   :  { %2142 = vst [vmem:[#allocation2 + $0xe8] sm:$0xff] %v1940_v2 }
 0x277   :  { %2141 = vst [vmem:[#allocation2 + $0xe0] sm:$0xff] %v1935_v56  ;;  %v2846_v34 = vpop.f32.mrb[64].mxu1 }
 0x278   :  { %v1950_v24 = vadd.f32 %v2846_v34, %v4017_v52  ;;  %v1944_v3 = vpop.f32.mrb[65].mxu1 }
 0x279   :  { %v1945_v60 = vadd.f32 %v4017_v52, %v1944_v3 }
 0x27a   :  { %2144 = vst [vmem:[#allocation2 + $0xf8] sm:$0xff] %v1950_v24 }
 0x27b   :  { %2143 = vst [vmem:[#allocation2 + $0xf0] sm:$0xff] %v1945_v60  ;;  %v2849_v12 = vpop.f32.mrb[66].mxu1 }
 0x27c   :  { %v1960_v5 = vadd.f32 %v2849_v12, %v4017_v52  ;;  %v1954_v23 = vpop.f32.mrb[67].mxu1 }
 0x27d   :  { %v1955_v62 = vadd.f32 %v4017_v52, %v1954_v23 }
 0x27e   :  { %2146 = vst [vmem:[#allocation2 + $0x108] sm:$0xff] %v1960_v5 }
 0x27f   :  { %2145 = vst [vmem:[#allocation2 + $0x100] sm:$0xff] %v1955_v62  ;;  %v2852_v19 = vpop.f32.mrb[68].mxu1 }
 0x280   :  { %v1970_v9 = vadd.f32 %v2852_v19, %v4017_v52  ;;  %v1964_v46 = vpop.f32.mrb[69].mxu1 }
 0x281   :  { %v1965_v8 = vadd.f32 %v4017_v52, %v1964_v46 }
 0x282   :  { %2148 = vst [vmem:[#allocation2 + $0x118] sm:$0xff] %v1970_v9 }
 0x283   :  { %2147 = vst [vmem:[#allocation2 + $0x110] sm:$0xff] %v1965_v8  ;;  %v2855_v27 = vpop.f32.mrb[70].mxu1 }
 0x284   :  { %v1980_v29 = vadd.f32 %v2855_v27, %v4017_v52  ;;  %v1974_v31 = vpop.f32.mrb[71].mxu1 }
 0x285   :  { %v1975_v33 = vadd.f32 %v4017_v52, %v1974_v31 }
 0x286   :  { %2150 = vst [vmem:[#allocation2 + $0x128] sm:$0xff] %v1980_v29 }
 0x287   :  { %2149 = vst [vmem:[#allocation2 + $0x120] sm:$0xff] %v1975_v33  ;;  %v2858_v35 = vpop.f32.mrb[72].mxu1 }
 0x288   :  { %v1990_v37 = vadd.f32 %v2858_v35, %v4017_v52  ;;  %v1984_v39 = vpop.f32.mrb[73].mxu1 }
 0x289   :  { %v1985_v41 = vadd.f32 %v4017_v52, %v1984_v39 }
 0x28a   :  { %2152 = vst [vmem:[#allocation2 + $0x138] sm:$0xff] %v1990_v37 }
 0x28b   :  { %2151 = vst [vmem:[#allocation2 + $0x130] sm:$0xff] %v1985_v41  ;;  %v2861_v43 = vpop.f32.mrb[74].mxu1 }
 0x28c   :  { %v2000_v45 = vadd.f32 %v2861_v43, %v4017_v52  ;;  %v1994_v47 = vpop.f32.mrb[75].mxu1 }
 0x28d   :  { %v1995_v49 = vadd.f32 %v4017_v52, %v1994_v47 }
 0x28e   :  { %2154 = vst [vmem:[#allocation2 + $0x148] sm:$0xff] %v2000_v45 }
 0x28f   :  { %2153 = vst [vmem:[#allocation2 + $0x140] sm:$0xff] %v1995_v49  ;;  %v2864_v51 = vpop.f32.mrb[76].mxu1 }
 0x290   :  { %v2010_v53 = vadd.f32 %v2864_v51, %v4017_v52  ;;  %v2004_v55 = vpop.f32.mrb[77].mxu1 }
 0x291   :  { %v2005_v57 = vadd.f32 %v4017_v52, %v2004_v55 }
 0x292   :  { %2156 = vst [vmem:[#allocation2 + $0x158] sm:$0xff] %v2010_v53 }
 0x293   :  { %2155 = vst [vmem:[#allocation2 + $0x150] sm:$0xff] %v2005_v57  ;;  %v2867_v59 = vpop.f32.mrb[78].mxu1 }
 0x294   :  { %v2020_v61 = vadd.f32 %v2867_v59, %v4017_v52  ;;  %v2014_v63 = vpop.f32.mrb[79].mxu1 }
 0x295   :  { %v2015_v4 = vadd.f32 %v4017_v52, %v2014_v63 }
 0x296   :  { %2158 = vst [vmem:[#allocation2 + $0x168] sm:$0xff] %v2020_v61 }
 0x297   :  { %2157 = vst [vmem:[#allocation2 + $0x160] sm:$0xff] %v2015_v4  ;;  %v2870_v7 = vpop.f32.mrb[80].mxu1 }
 0x298   :  { %v2030_v16 = vadd.f32 %v2870_v7, %v4017_v52  ;;  %v2024_v48 = vpop.f32.mrb[81].mxu1 }
 0x299   :  { %v2025_v26 = vadd.f32 %v4017_v52, %v2024_v48 }
 0x29a   :  { %2160 = vst [vmem:[#allocation2 + $0x178] sm:$0xff] %v2030_v16 }
 0x29b   :  { %2159 = vst [vmem:[#allocation2 + $0x170] sm:$0xff] %v2025_v26  ;;  %v2873_v58 = vpop.f32.mrb[82].mxu1 }
 0x29c   :  { %v2040_v18 = vadd.f32 %v2873_v58, %v4017_v52  ;;  %v2034_v54 = vpop.f32.mrb[83].mxu1 }
 0x29d   :  { %v2035_v13 = vadd.f32 %v4017_v52, %v2034_v54 }
 0x29e   :  { %2162 = vst [vmem:[#allocation2 + $0x188] sm:$0xff] %v2040_v18 }
 0x29f   :  { %2161 = vst [vmem:[#allocation2 + $0x180] sm:$0xff] %v2035_v13  ;;  %v2876_v36 = vpop.f32.mrb[84].mxu1 }
 0x2a0   :  { %v2050_v6 = vadd.f32 %v2876_v36, %v4017_v52  ;;  %v2044_v25 = vpop.f32.mrb[85].mxu1 }
 0x2a1   :  { %v2045_v38 = vadd.f32 %v4017_v52, %v2044_v25 }
 0x2a2   :  { %2164 = vst [vmem:[#allocation2 + $0x198] sm:$0xff] %v2050_v6 }
 0x2a3   :  { %2163 = vst [vmem:[#allocation2 + $0x190] sm:$0xff] %v2045_v38  ;;  %v2879_v50 = vpop.f32.mrb[86].mxu1 }
 0x2a4   :  { %v2060_v42 = vadd.f32 %v2879_v50, %v4017_v52  ;;  %v2054_v28 = vpop.f32.mrb[87].mxu1 }
 0x2a5   :  { %v2055_v20 = vadd.f32 %v4017_v52, %v2054_v28 }
 0x2a6   :  { %2166 = vst [vmem:[#allocation2 + $0x1a8] sm:$0xff] %v2060_v42 }
 0x2a7   :  { %2165 = vst [vmem:[#allocation2 + $0x1a0] sm:$0xff] %v2055_v20  ;;  %v2882_v14 = vpop.f32.mrb[88].mxu1 }
 0x2a8   :  { %v2070_v30 = vadd.f32 %v2882_v14, %v4017_v52  ;;  %v2064_v21 = vpop.f32.mrb[89].mxu1 }
 0x2a9   :  { %v2065_v22 = vadd.f32 %v4017_v52, %v2064_v21 }
 0x2aa   :  { %2168 = vst [vmem:[#allocation2 + $0x1b8] sm:$0xff] %v2070_v30 }
 0x2ab   :  { %2167 = vst [vmem:[#allocation2 + $0x1b0] sm:$0xff] %v2065_v22  ;;  %v2885_v44 = vpop.f32.mrb[90].mxu1 }
 0x2ac   :  { %v2080_v40 = vadd.f32 %v2885_v44, %v4017_v52  ;;  %v2074_v17 = vpop.f32.mrb[91].mxu1 }
 0x2ad   :  { %v2075_v0 = vadd.f32 %v4017_v52, %v2074_v17 }
 0x2ae   :  { %2170 = vst [vmem:[#allocation2 + $0x1c8] sm:$0xff] %v2080_v40 }
 0x2af   :  { %2169 = vst [vmem:[#allocation2 + $0x1c0] sm:$0xff] %v2075_v0  ;;  %v2888_v1 = vpop.f32.mrb[92].mxu1 }
 0x2b0   :  { %v2090_v10 = vadd.f32 %v2888_v1, %v4017_v52  ;;  %v2084_v15 = vpop.f32.mrb[93].mxu1 }
 0x2b1   :  { %v2085_v32 = vadd.f32 %v4017_v52, %v2084_v15 }
 0x2b2   :  { %2172 = vst [vmem:[#allocation2 + $0x1d8] sm:$0xff] %v2090_v10 }
 0x2b3   :  { %2171 = vst [vmem:[#allocation2 + $0x1d0] sm:$0xff] %v2085_v32  ;;  %v2891_v2 = vpop.f32.mrb[94].mxu1 }
 0x2b4   :  { %v2100_v11 = vadd.f32 %v2891_v2, %v4017_v52  ;;  %v2094_v56 = vpop.f32.mrb[95].mxu1 }
 0x2b5   :  { %v2095_v34 = vadd.f32 %v4017_v52, %v2094_v56 }
 0x2b6   :  { %2174 = vst [vmem:[#allocation2 + $0x1e8] sm:$0xff] %v2100_v11 }
 0x2b7   :  { %2173 = vst [vmem:[#allocation2 + $0x1e0] sm:$0xff] %v2095_v34  ;;  %v2894_v24 = vpop.f32.mrb[96].mxu1 }
 0x2b8   :  { %v2110_v3 = vadd.f32 %v2894_v24, %v4017_v52  ;;  %v2104_v60 = vpop.f32.mrb[97].mxu1 }
 0x2b9   :  { %v2105_v12 = vadd.f32 %v4017_v52, %v2104_v60 }
 0x2ba   :  { %2176 = vst [vmem:[#allocation2 + $0x1f8] sm:$0xff] %v2110_v3 }
 0x2bb   :  { %2175 = vst [vmem:[#allocation2 + $0x1f0] sm:$0xff] %v2105_v12 }
 0x2bc   :  { %2927 = shalt.err (!%p2924_p4)
}
 0x2bd   :  { %s2928_s18 = scalar_lea.hbm %s4103_s8, 8192 }
 0x2be   :  { %p2929_p5 = scmp.ne.s32.totalorder %s4103_s8, %s2928_s18  ;;  %p2932_p6 = scmp.lt.u32.totalorder %s2928_s18, %s4103_s8 }
 0x2c0   :  { %p2934_p7 = pnand %p2932_p6, %p2929_p5 }
 0x2c2   :  { %2937 = shalt.err (!%p2934_p7)
}
 0x2c3   :  { %s2941_s21 = smov 128   ;;  %s2942_s22 = smov 8  }
 0x2c4   :  { %2188 = dma.vmem_to_hbm [thread:$0]  %s2183_s14, 8192, %s4103_s8, [#allocation3], %s2941_s21, %s2941_s21, %s2942_s22  }
 0x2c5   :  { %2938 = dma.done.wait [#allocation3], 8192  }
 0x2c6   :  { %2939 = vsyncadd [#allocation3], 4294959104 }
 0x2c7   :  { %2192 = vsyncpa [#allocation3], 1 }

</bundles_post_ra>
